<compile_context>
chip_gen: v5e
topology: v5e:2x2
jax: 0.10.0
libtpu: 0.0.40
codegen_flags: <defaults>
</compile_context>

<pallas_src>
import jax
import jax.numpy as jnp
from jax.experimental import pallas as pl
from jax.experimental.pallas import tpu as pltpu

LANE = 128
TC = 8           # time steps per grid step (sublane-full output blocks)


# ----------------------------------------------------------------------------
# Recurrent kernel: one grid step == TC GRU time steps
# ----------------------------------------------------------------------------
def _gru_chunk_kernel(gi_ref,       # (Tc, 3Hp)  precomputed x@W_ih^T + folded biases
                      w_hh_t_ref,   # (Hp, 3Hp)  W_hh^T, VMEM-resident (constant idx map)
                      b_hh_n_ref,   # (1, Hp)    b_hh for the n gate
                      h0_ref,       # (1, Hp)    initial hidden state
                      out_ref,      # (Tc, Hp)   per-chunk hidden-state slab
                      h_scr):       # VMEM (1, Hp) hidden carried across chunks
    Hp = h_scr.shape[-1]
    Tc = out_ref.shape[0]
    c = pl.program_id(0)

    @pl.when(c == 0)
    def _():
        h_scr[...] = h0_ref[...]

    w_hh = w_hh_t_ref[...]          # hoisted: loaded once per chunk
    b_hh_n = b_hh_n_ref[...]
    wdt = w_hh.dtype                # supports bf16 weights with f32 accumulate

    h = h_scr[...]                  # (1, Hp) f32, carried in vregs inside the chunk
    for s in range(Tc):             # static unroll (Tc small, fixed)
        gi = gi_ref[pl.ds(s, 1), :]                                   # (1, 3Hp)
        gh = jnp.dot(h.astype(wdt), w_hh,
                     preferred_element_type=jnp.float32)              # (1, 3Hp)
        # r and z share one fused sigmoid over a lane-aligned 2*Hp slab.
        rz = jax.nn.sigmoid(gi[:, :2 * Hp] + gh[:, :2 * Hp])
        r = rz[:, :Hp]
        z = rz[:, Hp:]
        n = jnp.tanh(gi[:, 2 * Hp:] + r * (gh[:, 2 * Hp:] + b_hh_n))
        h = n + z * (h - n)         # == (1 - z) * n + z * h
        out_ref[pl.ds(s, 1), :] = h.astype(out_ref.dtype)

    h_scr[...] = h


# ----------------------------------------------------------------------------
# Parameter preparation (done ONCE, outside the per-forward path)
# ----------------------------------------------------------------------------
def init_encoder_params(key, input_size, hidden_dims):
    """Deterministic synthetic parameters, torch layout (Embedding + nn.GRU)."""
    k_emb, k_wih, k_whh, k_bih, k_bhh = jax.random.split(key, 5)
    scale = 1.0 / jnp.sqrt(hidden_dims)
    return {
        "embedding": jax.random.normal(k_emb, (input_size, hidden_dims), jnp.float32),
        "w_ih": jax.random.uniform(k_wih, (3 * hidden_dims, hidden_dims),
                                   jnp.float32, -scale, scale),
        "w_hh": jax.random.uniform(k_whh, (3 * hidden_dims, hidden_dims),
                                   jnp.float32, -scale, scale),
        "b_ih": jax.random.uniform(k_bih, (3 * hidden_dims,),
                                   jnp.float32, -scale, scale),
        "b_hh": jax.random.uniform(k_bhh, (3 * hidden_dims,),
                                   jnp.float32, -scale, scale),
    }


def prepare_encoder_params(params, *, weight_dtype=jnp.float32):
    """One-time conversion of torch-layout params into the kernel layout:
    transpose weights to (Hp, 3Hp), gate-aware pad the hidden dim to a
    multiple of 128 lanes, fold every h-independent bias into `gi_bias`
    (added once during the hoisted input projection), keep only b_hh_n.
    weight_dtype=jnp.bfloat16 halves weight HBM/VMEM traffic on v6e/v7x
    (accumulation stays f32); note bf16 casts of h compound over long T.
    """
    emb = params["embedding"]
    V, H = emb.shape
    Hp = ((H + LANE - 1) // LANE) * LANE
    pad_h = Hp - H

    def pad_gate_mat(w):              # w: (3H, H) torch layout -> (Hp, 3Hp)
        wt = w.T                      # (H, 3H)
        blocks = [wt[:, g * H:(g + 1) * H] for g in range(3)]
        blocks = [jnp.pad(b, ((0, pad_h), (0, pad_h))) for b in blocks]
        return jnp.concatenate(blocks, axis=1)

    def pad_gate_vec(b):              # b: (3H,) -> three (Hp,) vectors
        return [jnp.pad(b[g * H:(g + 1) * H], (0, pad_h)) for g in range(3)]

    bi_r, bi_z, bi_n = pad_gate_vec(params["b_ih"])
    bh_r, bh_z, bh_n = pad_gate_vec(params["b_hh"])

    # Bias added to the precomputed input projection: [r | z | n] gate order,
    # with the hh halves of r/z folded in (they are h-independent constants).
    gi_bias = jnp.concatenate([bi_r + bh_r, bi_z + bh_z, bi_n]).reshape(1, 3 * Hp)

    return {
        "hidden_dims": H,
        "padded_dims": Hp,
        "embedding": jnp.pad(emb, ((0, 0), (0, pad_h))).astype(weight_dtype),
        "w_ih_t": pad_gate_mat(params["w_ih"]).astype(weight_dtype),
        "w_hh_t": pad_gate_mat(params["w_hh"]).astype(weight_dtype),
        "gi_bias": gi_bias.astype(jnp.float32),
        "b_hh_n": bh_n.reshape(1, Hp).astype(jnp.float32),
    }


# ----------------------------------------------------------------------------
# Forward wrappers
# ----------------------------------------------------------------------------
def encoder_run_sequence(tokens, prev_hidden, kparams, *, time_chunk=TC):
    """Run the encoder GRU over a whole token sequence.

    tokens:      int (T,) word indices
    prev_hidden: float32 (1, 1, H) initial hidden state
    Returns (outputs (T, 1, H), hidden (1, 1, H)), matching torch.nn.GRU with
    batch=1, single layer (outputs[t] == hidden after step t).
    """
    H = kparams["hidden_dims"]
    Hp = kparams["padded_dims"]
    T = int(tokens.shape[0])
    Tc = int(time_chunk)
    Tp = ((T + Tc - 1) // Tc) * Tc
    num_chunks = Tp // Tc

    # ---- Hoisted input projection (one batched gather + matmul over all T;
    # ---- plain XLA ops per the perf review -- not on the recurrent path).
    x_all = jnp.take(kparams["embedding"], tokens.astype(jnp.int32), axis=0)   # (T, Hp)
    gi_all = jnp.dot(x_all, kparams["w_ih_t"],
                     preferred_element_type=jnp.float32) + kparams["gi_bias"]  # (T, 3Hp)
    if Tp != T:
        # Padded time steps run harmless dummy math after all real steps; their
        # outputs are sliced off below and never affect rows < T.
        gi_all = jnp.pad(gi_all, ((0, Tp - T), (0, 0)))

    h0 = prev_hidden.reshape(1, H).astype(jnp.float32)
    if Hp != H:
        h0 = jnp.pad(h0, ((0, 0), (0, Hp - H)))

    grid_spec = pltpu.PrefetchScalarGridSpec(
        num_scalar_prefetch=0,
        grid=(num_chunks,),
        in_specs=[
            # per-chunk slab of precomputed input projections
            pl.BlockSpec((Tc, 3 * Hp), lambda c: (c, 0)),
            # constant index_map -> fetched once, stays VMEM-resident
            pl.BlockSpec((Hp, 3 * Hp), lambda c: (0, 0)),
            pl.BlockSpec((1, Hp), lambda c: (0, 0)),
            pl.BlockSpec((1, Hp), lambda c: (0, 0)),
        ],
        out_specs=pl.BlockSpec((Tc, Hp), lambda c: (c, 0)),
        scratch_shapes=[pltpu.VMEM((1, Hp), jnp.float32)],
    )

    out_padded = pl.pallas_call(
        _gru_chunk_kernel,
        grid_spec=grid_spec,
        out_shape=jax.ShapeDtypeStruct((Tp, Hp), jnp.float32),
        compiler_params=pltpu.CompilerParams(
            dimension_semantics=("arbitrary",),      # true time recurrence
            vmem_limit_bytes=32 * 1024 * 1024),
    )(gi_all, kparams["w_hh_t"], kparams["b_hh_n"], h0)

    outputs = out_padded[:T, :H].reshape(T, 1, H)    # (T, 1, H)
    hidden = outputs[-1].reshape(1, 1, H)            # final hidden == last output
    return outputs, hidden


def encoder_forward(word_idx, prev_hidden, kparams):
    """Single-step API matching Encoder.forward(word_var, prev_hidden)."""
    tokens = jnp.asarray(word_idx).reshape((1,)).astype(jnp.int32)
    outputs, hidden = encoder_run_sequence(tokens, prev_hidden, kparams)
    return outputs.reshape(1, 1, -1), hidden


# ----------------------------------------------------------------------------
# Pure-JAX reference (mirrors torch.nn.Embedding + torch.nn.GRU math)
# ----------------------------------------------------------------------------
def _reference_gru_sequence(tokens, prev_hidden, params):
    H = params["embedding"].shape[1]
    h = prev_hidden.reshape(1, H)
    outs = []
    for t in range(int(tokens.shape[0])):
        x = params["embedding"][tokens[t]].reshape(1, H)
        gi = x @ params["w_ih"].T + params["b_ih"]
        gh = h @ params["w_hh"].T + params["b_hh"]
        gi_r, gi_z, gi_n = gi[:, :H], gi[:, H:2 * H], gi[:, 2 * H:]
        gh_r, gh_z, gh_n = gh[:, :H], gh[:, H:2 * H], gh[:, 2 * H:]
        r = jax.nn.sigmoid(gi_r + gh_r)
        z = jax.nn.sigmoid(gi_z + gh_z)
        n = jnp.tanh(gi_n + r * gh_n)
        h = (1.0 - z) * n + z * h
        outs.append(h)
    return jnp.stack(outs, axis=0), h.reshape(1, 1, H)   # (T,1,H), (1,1,H)


if __name__ == "__main__":
    INPUT_SIZE = 16     # vocabulary size
    HIDDEN = 128        # hidden_dims
    SEQ_LEN = 8

    key = jax.random.PRNGKey(0)
    params = init_encoder_params(key, INPUT_SIZE, HIDDEN)   # torch layout
    kparams = prepare_encoder_params(params)                # one-time kernel layout

    tokens = jax.random.randint(jax.random.PRNGKey(1), (SEQ_LEN,), 0, INPUT_SIZE,
                                dtype=jnp.int32)
    prev_hidden = jnp.zeros((1, 1, HIDDEN), dtype=jnp.float32)   # Encoder.init_hidden()

    # Whole sequence encoded with a single pallas_call (grid over time chunks).
    outputs, hidden = encoder_run_sequence(tokens, prev_hidden, kparams)
    outputs = jax.block_until_ready(outputs)
    hidden = jax.block_until_ready(hidden)

    ref_outputs, ref_hidden = _reference_gru_sequence(tokens, prev_hidden, params)
    assert outputs.shape == (SEQ_LEN, 1, HIDDEN)
    assert hidden.shape == (1, 1, HIDDEN)
    assert jnp.allclose(outputs, ref_outputs, atol=1e-4, rtol=1e-4)
    assert jnp.allclose(hidden, ref_hidden, atol=1e-4, rtol=1e-4)

    # Sequence length NOT a multiple of the time chunk (exercises multi-chunk
    # carry through the VMEM scratch + tail padding).
    tokens11 = jax.random.randint(jax.random.PRNGKey(2), (11,), 0, INPUT_SIZE,
                                  dtype=jnp.int32)
    out11, hid11 = encoder_run_sequence(tokens11, prev_hidden, kparams)
    out11 = jax.block_until_ready(out11)
    ref_out11, ref_hid11 = _reference_gru_sequence(tokens11, prev_hidden, params)
    assert out11.shape == (11, 1, HIDDEN)
    assert jnp.allclose(out11, ref_out11, atol=1e-4, rtol=1e-4)
    assert jnp.allclose(hid11, ref_hid11, atol=1e-4, rtol=1e-4)

    # Single-step API (matches Encoder.forward signature semantics).
    out1, hid1 = encoder_forward(tokens[:1], prev_hidden, kparams)
    out1 = jax.block_until_ready(out1)
    hid1 = jax.block_until_ready(hid1)
    assert out1.shape == (1, 1, HIDDEN) and hid1.shape == (1, 1, HIDDEN)
    assert jnp.allclose(out1, ref_outputs[0:1], atol=1e-4, rtol=1e-4)
    assert jnp.allclose(hid1, out1, atol=1e-6, rtol=1e-6)

    print("KERNEL_OK")
</pallas_src>

<mosaic_0001>
module attributes {stable_mosaic.version = 11 : i64} {
  func.func @_gru_chunk_kernel(%arg0: i32, %arg1: memref<8x384xf32, #tpu.memory_space<vmem>>, %arg2: memref<128x384xf32, #tpu.memory_space<vmem>>, %arg3: memref<1x128xf32, #tpu.memory_space<vmem>>, %arg4: memref<1x128xf32, #tpu.memory_space<vmem>>, %arg5: memref<8x128xf32, #tpu.memory_space<vmem>>, %arg6: memref<1x128xf32, #tpu.memory_space<vmem>>) attributes {dimension_semantics = [#tpu.dimension_semantics<arbitrary>], iteration_bounds = array<i64: 1>, scalar_prefetch = 0 : i64, scratch_operands = 1 : i64, tpu.core_type = #tpu.core_type<tc>, window_params = [{transform_indices = @transform_0, window_bounds = array<i64: 8, 384>}, {pipeline_mode = #tpu.pipeline_mode<synchronous>, transform_indices = @transform_1, window_bounds = array<i64: 128, 384>}, {pipeline_mode = #tpu.pipeline_mode<synchronous>, transform_indices = @transform_2, window_bounds = array<i64: 1, 128>}, {pipeline_mode = #tpu.pipeline_mode<synchronous>, transform_indices = @transform_3, window_bounds = array<i64: 1, 128>}, {transform_indices = @transform_4, window_bounds = array<i64: 8, 128>}]} {
    %c0_i32 = arith.constant 0 : i32
    %0 = arith.cmpi eq, %arg0, %c0_i32 : i32
    %1 = arith.extui %0 : i1 to i32
    %c0_i32_0 = arith.constant 0 : i32
    %2 = arith.cmpi ne, %1, %c0_i32_0 : i32
    scf.if %2 {
      %c0_48 = arith.constant 0 : index
      %c0_49 = arith.constant 0 : index
      %183 = vector.load %arg4[%c0_48, %c0_49] : memref<1x128xf32, #tpu.memory_space<vmem>>, vector<1x128xf32>
      %c0_50 = arith.constant 0 : index
      %c0_51 = arith.constant 0 : index
      %184 = vector.load %arg6[%c0_50, %c0_51] : memref<1x128xf32, #tpu.memory_space<vmem>>, vector<1x128xf32>
      tpu.vector_store %arg6[%c0_50, %c0_51], %183 {strides = array<i32>} : memref<1x128xf32, #tpu.memory_space<vmem>>, vector<1x128xf32>,
    } else {
    }
    %c0 = arith.constant 0 : index
    %c0_1 = arith.constant 0 : index
    %3 = vector.load %arg2[%c0, %c0_1] : memref<128x384xf32, #tpu.memory_space<vmem>>, vector<128x384xf32>
    %c0_2 = arith.constant 0 : index
    %c0_3 = arith.constant 0 : index
    %4 = vector.load %arg3[%c0_2, %c0_3] : memref<1x128xf32, #tpu.memory_space<vmem>>, vector<1x128xf32>
    %c0_4 = arith.constant 0 : index
    %c0_5 = arith.constant 0 : index
    %5 = vector.load %arg6[%c0_4, %c0_5] : memref<1x128xf32, #tpu.memory_space<vmem>>, vector<1x128xf32>
    %c0_6 = arith.constant 0 : index
    %c0_7 = arith.constant 0 : index
    %6 = vector.load %arg1[%c0_6, %c0_7] : memref<8x384xf32, #tpu.memory_space<vmem>>, vector<1x384xf32>
    %cst = arith.constant dense<0.000000e+00> : vector<1x384xf32>
    %7 = tpu.matmul %5, %3, %cst {dimension_numbers = #tpu.dot_dimension_numbers<[1], [0], [0], [1], [0, 0, 1, 1], [], []>} : vector<1x128xf32>, vector<128x384xf32>, vector<1x384xf32> -> vector<1x384xf32>
    %8 = vector.extract_strided_slice %6 {offsets = [0, 0], sizes = [1, 256], strides = [1, 1]} : vector<1x384xf32> to vector<1x256xf32>
    %9 = vector.extract_strided_slice %7 {offsets = [0, 0], sizes = [1, 256], strides = [1, 1]} : vector<1x384xf32> to vector<1x256xf32>
    %10 = arith.addf %8, %9 : vector<1x256xf32>
    %11 = arith.negf %10 : vector<1x256xf32>
    %12 = math.exp %11 : vector<1x256xf32>
    %cst_8 = arith.constant 1.000000e+00 : f32
    %13 = vector.broadcast %cst_8 : f32 to vector<1x256xf32>
    %14 = arith.addf %13, %12 : vector<1x256xf32>
    %15 = arith.divf %13, %14 : vector<1x256xf32>
    %16 = vector.extract_strided_slice %15 {offsets = [0, 0], sizes = [1, 128], strides = [1, 1]} : vector<1x256xf32> to vector<1x128xf32>
    %17 = vector.extract_strided_slice %15 {offsets = [0, 128], sizes = [1, 128], strides = [1, 1]} : vector<1x256xf32> to vector<1x128xf32>
    %18 = vector.extract_strided_slice %6 {offsets = [0, 256], sizes = [1, 128], strides = [1, 1]} : vector<1x384xf32> to vector<1x128xf32>
    %19 = vector.extract_strided_slice %7 {offsets = [0, 256], sizes = [1, 128], strides = [1, 1]} : vector<1x384xf32> to vector<1x128xf32>
    %20 = arith.addf %19, %4 : vector<1x128xf32>
    %21 = arith.mulf %16, %20 : vector<1x128xf32>
    %22 = arith.addf %18, %21 : vector<1x128xf32>
    %23 = math.tanh %22 : vector<1x128xf32>
    %24 = arith.subf %5, %23 : vector<1x128xf32>
    %25 = arith.mulf %17, %24 : vector<1x128xf32>
    %26 = arith.addf %23, %25 : vector<1x128xf32>
    %c0_9 = arith.constant 0 : index
    %c0_10 = arith.constant 0 : index
    %27 = vector.load %arg5[%c0_9, %c0_10] : memref<8x128xf32, #tpu.memory_space<vmem>>, vector<1x128xf32>
    tpu.vector_store %arg5[%c0_9, %c0_10], %26 {strides = array<i32>} : memref<8x128xf32, #tpu.memory_space<vmem>>, vector<1x128xf32>,
    %c1 = arith.constant 1 : index
    %c0_11 = arith.constant 0 : index
    %28 = vector.load %arg1[%c1, %c0_11] : memref<8x384xf32, #tpu.memory_space<vmem>>, vector<1x384xf32>
    %cst_12 = arith.constant dense<0.000000e+00> : vector<1x384xf32>
    %29 = tpu.matmul %26, %3, %cst_12 {dimension_numbers = #tpu.dot_dimension_numbers<[1], [0], [0], [1], [0, 0, 1, 1], [], []>} : vector<1x128xf32>, vector<128x384xf32>, vector<1x384xf32> -> vector<1x384xf32>
    %30 = vector.extract_strided_slice %28 {offsets = [0, 0], sizes = [1, 256], strides = [1, 1]} : vector<1x384xf32> to vector<1x256xf32>
    %31 = vector.extract_strided_slice %29 {offsets = [0, 0], sizes = [1, 256], strides = [1, 1]} : vector<1x384xf32> to vector<1x256xf32>
    %32 = arith.addf %30, %31 : vector<1x256xf32>
    %33 = arith.negf %32 : vector<1x256xf32>
    %34 = math.exp %33 : vector<1x256xf32>
    %cst_13 = arith.constant 1.000000e+00 : f32
    %35 = vector.broadcast %cst_13 : f32 to vector<1x256xf32>
    %36 = arith.addf %35, %34 : vector<1x256xf32>
    %37 = arith.divf %35, %36 : vector<1x256xf32>
    %38 = vector.extract_strided_slice %37 {offsets = [0, 0], sizes = [1, 128], strides = [1, 1]} : vector<1x256xf32> to vector<1x128xf32>
    %39 = vector.extract_strided_slice %37 {offsets = [0, 128], sizes = [1, 128], strides = [1, 1]} : vector<1x256xf32> to vector<1x128xf32>
    %40 = vector.extract_strided_slice %28 {offsets = [0, 256], sizes = [1, 128], strides = [1, 1]} : vector<1x384xf32> to vector<1x128xf32>
    %41 = vector.extract_strided_slice %29 {offsets = [0, 256], sizes = [1, 128], strides = [1, 1]} : vector<1x384xf32> to vector<1x128xf32>
    %42 = arith.addf %41, %4 : vector<1x128xf32>
    %43 = arith.mulf %38, %42 : vector<1x128xf32>
    %44 = arith.addf %40, %43 : vector<1x128xf32>
    %45 = math.tanh %44 : vector<1x128xf32>
    %46 = arith.subf %26, %45 : vector<1x128xf32>
    %47 = arith.mulf %39, %46 : vector<1x128xf32>
    %48 = arith.addf %45, %47 : vector<1x128xf32>
    %c1_14 = arith.constant 1 : index
    %c0_15 = arith.constant 0 : index
    %49 = vector.load %arg5[%c1_14, %c0_15] : memref<8x128xf32, #tpu.memory_space<vmem>>, vector<1x128xf32>
    tpu.vector_store %arg5[%c1_14, %c0_15], %48 {strides = array<i32>} : memref<8x128xf32, #tpu.memory_space<vmem>>, vector<1x128xf32>,
    %c2 = arith.constant 2 : index
    %c0_16 = arith.constant 0 : index
    %50 = vector.load %arg1[%c2, %c0_16] : memref<8x384xf32, #tpu.memory_space<vmem>>, vector<1x384xf32>
    %cst_17 = arith.constant dense<0.000000e+00> : vector<1x384xf32>
    %51 = tpu.matmul %48, %3, %cst_17 {dimension_numbers = #tpu.dot_dimension_numbers<[1], [0], [0], [1], [0, 0, 1, 1], [], []>} : vector<1x128xf32>, vector<128x384xf32>, vector<1x384xf32> -> vector<1x384xf32>
    %52 = vector.extract_strided_slice %50 {offsets = [0, 0], sizes = [1, 256], strides = [1, 1]} : vector<1x384xf32> to vector<1x256xf32>
    %53 = vector.extract_strided_slice %51 {offsets = [0, 0], sizes = [1, 256], strides = [1, 1]} : vector<1x384xf32> to vector<1x256xf32>
    %54 = arith.addf %52, %53 : vector<1x256xf32>
    %55 = arith.negf %54 : vector<1x256xf32>
    %56 = math.exp %55 : vector<1x256xf32>
    %cst_18 = arith.constant 1.000000e+00 : f32
    %57 = vector.broadcast %cst_18 : f32 to vector<1x256xf32>
    %58 = arith.addf %57, %56 : vector<1x256xf32>
    %59 = arith.divf %57, %58 : vector<1x256xf32>
    %60 = vector.extract_strided_slice %59 {offsets = [0, 0], sizes = [1, 128], strides = [1, 1]} : vector<1x256xf32> to vector<1x128xf32>
    %61 = vector.extract_strided_slice %59 {offsets = [0, 128], sizes = [1, 128], strides = [1, 1]} : vector<1x256xf32> to vector<1x128xf32>
    %62 = vector.extract_strided_slice %50 {offsets = [0, 256], sizes = [1, 128], strides = [1, 1]} : vector<1x384xf32> to vector<1x128xf32>
    %63 = vector.extract_strided_slice %51 {offsets = [0, 256], sizes = [1, 128], strides = [1, 1]} : vector<1x384xf32> to vector<1x128xf32>
    %64 = arith.addf %63, %4 : vector<1x128xf32>
    %65 = arith.mulf %60, %64 : vector<1x128xf32>
    %66 = arith.addf %62, %65 : vector<1x128xf32>
    %67 = math.tanh %66 : vector<1x128xf32>
    %68 = arith.subf %48, %67 : vector<1x128xf32>
    %69 = arith.mulf %61, %68 : vector<1x128xf32>
    %70 = arith.addf %67, %69 : vector<1x128xf32>
    %c2_19 = arith.constant 2 : index
    %c0_20 = arith.constant 0 : index
    %71 = vector.load %arg5[%c2_19, %c0_20] : memref<8x128xf32, #tpu.memory_space<vmem>>, vector<1x128xf32>
    tpu.vector_store %arg5[%c2_19, %c0_20], %70 {strides = array<i32>} : memref<8x128xf32, #tpu.memory_space<vmem>>, vector<1x128xf32>,
    %c3 = arith.constant 3 : index
    %c0_21 = arith.constant 0 : index
    %72 = vector.load %arg1[%c3, %c0_21] : memref<8x384xf32, #tpu.memory_space<vmem>>, vector<1x384xf32>
    %cst_22 = arith.constant dense<0.000000e+00> : vector<1x384xf32>
    %73 = tpu.matmul %70, %3, %cst_22 {dimension_numbers = #tpu.dot_dimension_numbers<[1], [0], [0], [1], [0, 0, 1, 1], [], []>} : vector<1x128xf32>, vector<128x384xf32>, vector<1x384xf32> -> vector<1x384xf32>
    %74 = vector.extract_strided_slice %72 {offsets = [0, 0], sizes = [1, 256], strides = [1, 1]} : vector<1x384xf32> to vector<1x256xf32>
    %75 = vector.extract_strided_slice %73 {offsets = [0, 0], sizes = [1, 256], strides = [1, 1]} : vector<1x384xf32> to vector<1x256xf32>
    %76 = arith.addf %74, %75 : vector<1x256xf32>
    %77 = arith.negf %76 : vector<1x256xf32>
    %78 = math.exp %77 : vector<1x256xf32>
    %cst_23 = arith.constant 1.000000e+00 : f32
    %79 = vector.broadcast %cst_23 : f32 to vector<1x256xf32>
    %80 = arith.addf %79, %78 : vector<1x256xf32>
    %81 = arith.divf %79, %80 : vector<1x256xf32>
    %82 = vector.extract_strided_slice %81 {offsets = [0, 0], sizes = [1, 128], strides = [1, 1]} : vector<1x256xf32> to vector<1x128xf32>
    %83 = vector.extract_strided_slice %81 {offsets = [0, 128], sizes = [1, 128], strides = [1, 1]} : vector<1x256xf32> to vector<1x128xf32>
    %84 = vector.extract_strided_slice %72 {offsets = [0, 256], sizes = [1, 128], strides = [1, 1]} : vector<1x384xf32> to vector<1x128xf32>
    %85 = vector.extract_strided_slice %73 {offsets = [0, 256], sizes = [1, 128], strides = [1, 1]} : vector<1x384xf32> to vector<1x128xf32>
    %86 = arith.addf %85, %4 : vector<1x128xf32>
    %87 = arith.mulf %82, %86 : vector<1x128xf32>
    %88 = arith.addf %84, %87 : vector<1x128xf32>
    %89 = math.tanh %88 : vector<1x128xf32>
    %90 = arith.subf %70, %89 : vector<1x128xf32>
    %91 = arith.mulf %83, %90 : vector<1x128xf32>
    %92 = arith.addf %89, %91 : vector<1x128xf32>
    %c3_24 = arith.constant 3 : index
    %c0_25 = arith.constant 0 : index
    %93 = vector.load %arg5[%c3_24, %c0_25] : memref<8x128xf32, #tpu.memory_space<vmem>>, vector<1x128xf32>
    tpu.vector_store %arg5[%c3_24, %c0_25], %92 {strides = array<i32>} : memref<8x128xf32, #tpu.memory_space<vmem>>, vector<1x128xf32>,
    %c4 = arith.constant 4 : index
    %c0_26 = arith.constant 0 : index
    %94 = vector.load %arg1[%c4, %c0_26] : memref<8x384xf32, #tpu.memory_space<vmem>>, vector<1x384xf32>
    %cst_27 = arith.constant dense<0.000000e+00> : vector<1x384xf32>
    %95 = tpu.matmul %92, %3, %cst_27 {dimension_numbers = #tpu.dot_dimension_numbers<[1], [0], [0], [1], [0, 0, 1, 1], [], []>} : vector<1x128xf32>, vector<128x384xf32>, vector<1x384xf32> -> vector<1x384xf32>
    %96 = vector.extract_strided_slice %94 {offsets = [0, 0], sizes = [1, 256], strides = [1, 1]} : vector<1x384xf32> to vector<1x256xf32>
    %97 = vector.extract_strided_slice %95 {offsets = [0, 0], sizes = [1, 256], strides = [1, 1]} : vector<1x384xf32> to vector<1x256xf32>
    %98 = arith.addf %96, %97 : vector<1x256xf32>
    %99 = arith.negf %98 : vector<1x256xf32>
    %100 = math.exp %99 : vector<1x256xf32>
    %cst_28 = arith.constant 1.000000e+00 : f32
    %101 = vector.broadcast %cst_28 : f32 to vector<1x256xf32>
    %102 = arith.addf %101, %100 : vector<1x256xf32>
    %103 = arith.divf %101, %102 : vector<1x256xf32>
    %104 = vector.extract_strided_slice %103 {offsets = [0, 0], sizes = [1, 128], strides = [1, 1]} : vector<1x256xf32> to vector<1x128xf32>
    %105 = vector.extract_strided_slice %103 {offsets = [0, 128], sizes = [1, 128], strides = [1, 1]} : vector<1x256xf32> to vector<1x128xf32>
    %106 = vector.extract_strided_slice %94 {offsets = [0, 256], sizes = [1, 128], strides = [1, 1]} : vector<1x384xf32> to vector<1x128xf32>
    %107 = vector.extract_strided_slice %95 {offsets = [0, 256], sizes = [1, 128], strides = [1, 1]} : vector<1x384xf32> to vector<1x128xf32>
    %108 = arith.addf %107, %4 : vector<1x128xf32>
    %109 = arith.mulf %104, %108 : vector<1x128xf32>
    %110 = arith.addf %106, %109 : vector<1x128xf32>
    %111 = math.tanh %110 : vector<1x128xf32>
    %112 = arith.subf %92, %111 : vector<1x128xf32>
    %113 = arith.mulf %105, %112 : vector<1x128xf32>
    %114 = arith.addf %111, %113 : vector<1x128xf32>
    %c4_29 = arith.constant 4 : index
    %c0_30 = arith.constant 0 : index
    %115 = vector.load %arg5[%c4_29, %c0_30] : memref<8x128xf32, #tpu.memory_space<vmem>>, vector<1x128xf32>
    tpu.vector_store %arg5[%c4_29, %c0_30], %114 {strides = array<i32>} : memref<8x128xf32, #tpu.memory_space<vmem>>, vector<1x128xf32>,
    %c5 = arith.constant 5 : index
    %c0_31 = arith.constant 0 : index
    %116 = vector.load %arg1[%c5, %c0_31] : memref<8x384xf32, #tpu.memory_space<vmem>>, vector<1x384xf32>
    %cst_32 = arith.constant dense<0.000000e+00> : vector<1x384xf32>
    %117 = tpu.matmul %114, %3, %cst_32 {dimension_numbers = #tpu.dot_dimension_numbers<[1], [0], [0], [1], [0, 0, 1, 1], [], []>} : vector<1x128xf32>, vector<128x384xf32>, vector<1x384xf32> -> vector<1x384xf32>
    %118 = vector.extract_strided_slice %116 {offsets = [0, 0], sizes = [1, 256], strides = [1, 1]} : vector<1x384xf32> to vector<1x256xf32>
    %119 = vector.extract_strided_slice %117 {offsets = [0, 0], sizes = [1, 256], strides = [1, 1]} : vector<1x384xf32> to vector<1x256xf32>
    %120 = arith.addf %118, %119 : vector<1x256xf32>
    %121 = arith.negf %120 : vector<1x256xf32>
    %122 = math.exp %121 : vector<1x256xf32>
    %cst_33 = arith.constant 1.000000e+00 : f32
    %123 = vector.broadcast %cst_33 : f32 to vector<1x256xf32>
    %124 = arith.addf %123, %122 : vector<1x256xf32>
    %125 = arith.divf %123, %124 : vector<1x256xf32>
    %126 = vector.extract_strided_slice %125 {offsets = [0, 0], sizes = [1, 128], strides = [1, 1]} : vector<1x256xf32> to vector<1x128xf32>
    %127 = vector.extract_strided_slice %125 {offsets = [0, 128], sizes = [1, 128], strides = [1, 1]} : vector<1x256xf32> to vector<1x128xf32>
    %128 = vector.extract_strided_slice %116 {offsets = [0, 256], sizes = [1, 128], strides = [1, 1]} : vector<1x384xf32> to vector<1x128xf32>
    %129 = vector.extract_strided_slice %117 {offsets = [0, 256], sizes = [1, 128], strides = [1, 1]} : vector<1x384xf32> to vector<1x128xf32>
    %130 = arith.addf %129, %4 : vector<1x128xf32>
    %131 = arith.mulf %126, %130 : vector<1x128xf32>
    %132 = arith.addf %128, %131 : vector<1x128xf32>
    %133 = math.tanh %132 : vector<1x128xf32>
    %134 = arith.subf %114, %133 : vector<1x128xf32>
    %135 = arith.mulf %127, %134 : vector<1x128xf32>
    %136 = arith.addf %133, %135 : vector<1x128xf32>
    %c5_34 = arith.constant 5 : index
    %c0_35 = arith.constant 0 : index
    %137 = vector.load %arg5[%c5_34, %c0_35] : memref<8x128xf32, #tpu.memory_space<vmem>>, vector<1x128xf32>
    tpu.vector_store %arg5[%c5_34, %c0_35], %136 {strides = array<i32>} : memref<8x128xf32, #tpu.memory_space<vmem>>, vector<1x128xf32>,
    %c6 = arith.constant 6 : index
    %c0_36 = arith.constant 0 : index
    %138 = vector.load %arg1[%c6, %c0_36] : memref<8x384xf32, #tpu.memory_space<vmem>>, vector<1x384xf32>
    %cst_37 = arith.constant dense<0.000000e+00> : vector<1x384xf32>
    %139 = tpu.matmul %136, %3, %cst_37 {dimension_numbers = #tpu.dot_dimension_numbers<[1], [0], [0], [1], [0, 0, 1, 1], [], []>} : vector<1x128xf32>, vector<128x384xf32>, vector<1x384xf32> -> vector<1x384xf32>
    %140 = vector.extract_strided_slice %138 {offsets = [0, 0], sizes = [1, 256], strides = [1, 1]} : vector<1x384xf32> to vector<1x256xf32>
    %141 = vector.extract_strided_slice %139 {offsets = [0, 0], sizes = [1, 256], strides = [1, 1]} : vector<1x384xf32> to vector<1x256xf32>
    %142 = arith.addf %140, %141 : vector<1x256xf32>
    %143 = arith.negf %142 : vector<1x256xf32>
    %144 = math.exp %143 : vector<1x256xf32>
    %cst_38 = arith.constant 1.000000e+00 : f32
    %145 = vector.broadcast %cst_38 : f32 to vector<1x256xf32>
    %146 = arith.addf %145, %144 : vector<1x256xf32>
    %147 = arith.divf %145, %146 : vector<1x256xf32>
    %148 = vector.extract_strided_slice %147 {offsets = [0, 0], sizes = [1, 128], strides = [1, 1]} : vector<1x256xf32> to vector<1x128xf32>
    %149 = vector.extract_strided_slice %147 {offsets = [0, 128], sizes = [1, 128], strides = [1, 1]} : vector<1x256xf32> to vector<1x128xf32>
    %150 = vector.extract_strided_slice %138 {offsets = [0, 256], sizes = [1, 128], strides = [1, 1]} : vector<1x384xf32> to vector<1x128xf32>
    %151 = vector.extract_strided_slice %139 {offsets = [0, 256], sizes = [1, 128], strides = [1, 1]} : vector<1x384xf32> to vector<1x128xf32>
    %152 = arith.addf %151, %4 : vector<1x128xf32>
    %153 = arith.mulf %148, %152 : vector<1x128xf32>
    %154 = arith.addf %150, %153 : vector<1x128xf32>
    %155 = math.tanh %154 : vector<1x128xf32>
    %156 = arith.subf %136, %155 : vector<1x128xf32>
    %157 = arith.mulf %149, %156 : vector<1x128xf32>
    %158 = arith.addf %155, %157 : vector<1x128xf32>
    %c6_39 = arith.constant 6 : index
    %c0_40 = arith.constant 0 : index
    %159 = vector.load %arg5[%c6_39, %c0_40] : memref<8x128xf32, #tpu.memory_space<vmem>>, vector<1x128xf32>
    tpu.vector_store %arg5[%c6_39, %c0_40], %158 {strides = array<i32>} : memref<8x128xf32, #tpu.memory_space<vmem>>, vector<1x128xf32>,
    %c7 = arith.constant 7 : index
    %c0_41 = arith.constant 0 : index
    %160 = vector.load %arg1[%c7, %c0_41] : memref<8x384xf32, #tpu.memory_space<vmem>>, vector<1x384xf32>
    %cst_42 = arith.constant dense<0.000000e+00> : vector<1x384xf32>
    %161 = tpu.matmul %158, %3, %cst_42 {dimension_numbers = #tpu.dot_dimension_numbers<[1], [0], [0], [1], [0, 0, 1, 1], [], []>} : vector<1x128xf32>, vector<128x384xf32>, vector<1x384xf32> -> vector<1x384xf32>
    %162 = vector.extract_strided_slice %160 {offsets = [0, 0], sizes = [1, 256], strides = [1, 1]} : vector<1x384xf32> to vector<1x256xf32>
    %163 = vector.extract_strided_slice %161 {offsets = [0, 0], sizes = [1, 256], strides = [1, 1]} : vector<1x384xf32> to vector<1x256xf32>
    %164 = arith.addf %162, %163 : vector<1x256xf32>
    %165 = arith.negf %164 : vector<1x256xf32>
    %166 = math.exp %165 : vector<1x256xf32>
    %cst_43 = arith.constant 1.000000e+00 : f32
    %167 = vector.broadcast %cst_43 : f32 to vector<1x256xf32>
    %168 = arith.addf %167, %166 : vector<1x256xf32>
    %169 = arith.divf %167, %168 : vector<1x256xf32>
    %170 = vector.extract_strided_slice %169 {offsets = [0, 0], sizes = [1, 128], strides = [1, 1]} : vector<1x256xf32> to vector<1x128xf32>
    %171 = vector.extract_strided_slice %169 {offsets = [0, 128], sizes = [1, 128], strides = [1, 1]} : vector<1x256xf32> to vector<1x128xf32>
    %172 = vector.extract_strided_slice %160 {offsets = [0, 256], sizes = [1, 128], strides = [1, 1]} : vector<1x384xf32> to vector<1x128xf32>
    %173 = vector.extract_strided_slice %161 {offsets = [0, 256], sizes = [1, 128], strides = [1, 1]} : vector<1x384xf32> to vector<1x128xf32>
    %174 = arith.addf %173, %4 : vector<1x128xf32>
    %175 = arith.mulf %170, %174 : vector<1x128xf32>
    %176 = arith.addf %172, %175 : vector<1x128xf32>
    %177 = math.tanh %176 : vector<1x128xf32>
    %178 = arith.subf %158, %177 : vector<1x128xf32>
    %179 = arith.mulf %171, %178 : vector<1x128xf32>
    %180 = arith.addf %177, %179 : vector<1x128xf32>
    %c7_44 = arith.constant 7 : index
    %c0_45 = arith.constant 0 : index
    %181 = vector.load %arg5[%c7_44, %c0_45] : memref<8x128xf32, #tpu.memory_space<vmem>>, vector<1x128xf32>
    tpu.vector_store %arg5[%c7_44, %c0_45], %180 {strides = array<i32>} : memref<8x128xf32, #tpu.memory_space<vmem>>, vector<1x128xf32>,
    %c0_46 = arith.constant 0 : index
    %c0_47 = arith.constant 0 : index
    %182 = vector.load %arg6[%c0_46, %c0_47] : memref<1x128xf32, #tpu.memory_space<vmem>>, vector<1x128xf32>
    tpu.vector_store %arg6[%c0_46, %c0_47], %180 {strides = array<i32>} : memref<1x128xf32, #tpu.memory_space<vmem>>, vector<1x128xf32>,
    return
  }
  func.func @transform_0(%arg0: i32) -> (i32, i32) {
    %c0_i32 = arith.constant 0 : i32
    %c0_i32_0 = arith.constant 0 : i32
    return %arg0, %c0_i32 : i32, i32
  }
  func.func @transform_1(%arg0: i32) -> (i32, i32) {
    %c0_i32 = arith.constant 0 : i32
    %c0_i32_0 = arith.constant 0 : i32
    %c0_i32_1 = arith.constant 0 : i32
    return %c0_i32, %c0_i32_0 : i32, i32
  }
  func.func @transform_2(%arg0: i32) -> (i32, i32) {
    %c0_i32 = arith.constant 0 : i32
    %c0_i32_0 = arith.constant 0 : i32
    %c0_i32_1 = arith.constant 0 : i32
    return %c0_i32, %c0_i32_0 : i32, i32
  }
  func.func @transform_3(%arg0: i32) -> (i32, i32) {
    %c0_i32 = arith.constant 0 : i32
    %c0_i32_0 = arith.constant 0 : i32
    %c0_i32_1 = arith.constant 0 : i32
    return %c0_i32, %c0_i32_0 : i32, i32
  }
  func.func @transform_4(%arg0: i32) -> (i32, i32) {
    %c0_i32 = arith.constant 0 : i32
    %c0_i32_0 = arith.constant 0 : i32
    return %arg0, %c0_i32 : i32, i32
  }
}

</mosaic_0001>

<bundles_post_ra>
// kernel: tpu_custom_call.1
= control target key start
LH: loop header
LB: loop body
LE: loop exit
PB: predicated region body
PF: predicated region fallthrough
CT: control target
= control target key end

     0   :  { %9 = vsyncpa [#allocation4], 0  ;;  %s1660_s0 = inlined_call_operand.hbm [shape: f32[8,384], index: 0, kind: input, shape index: {}]   ;;  %s1661_s1 = inlined_call_operand.hbm [shape: f32[128,384], index: 1, kind: input, shape index: {}]   ;;  %s1662_s2 = inlined_call_operand.vmem [shape: f32[1,128], index: 2, kind: input, shape index: {}]   ;;  %s1663_s3 = inlined_call_operand.vmem [shape: f32[1,128], index: 3, kind: input, shape index: {}]   ;;  %s1664_s4 = inlined_call_operand.hbm [shape: f32[8,128], index: 4, kind: output, shape index: {}]  }
   0x1   :  { %10 = vsyncpa [#allocation7], 0 }
   0x2   :  { %11 = vsyncpa [#allocation5], 0  ;;  %s17_s17 = sshll.u32 %s1660_s0, 4  ;;  %s1106_s18 = smov [#allocation3]   ;;  %s18_s17 = int_to_ptr.hbm [resolvable:$true] %s17_s17 }
   0x3   :  { %s19_s19 = sshll.u32 %s1106_s18, 4  ;;  %s27_s22 = sshll.u32 %s1661_s1, 4  ;;  %s20_s19 = int_to_ptr.vmem [resolvable:$true] %s19_s19  ;;  %s28_s22 = int_to_ptr.hbm [resolvable:$true] %s27_s22 }
   0x4   :  { %22 = dma.hbm_to_vmem [thread:$0]  %s18_s17, 384, %s20_s19, [#allocation4]  }
   0x5   :  { %s1107_s23 = smov [#allocation6]   ;;  %s1108_s25 = smov 384  }
   0x6   :  { %s29_s24 = sshll.u32 %s1107_s23, 4  ;;  %s1109_s26 = smov 24   ;;  %s30_s24 = int_to_ptr.vmem [resolvable:$true] %s29_s24 }
   0x7   :  { %35 = dma.hbm_to_vmem [thread:$0]  %s28_s22, 6144, %s30_s24, [#allocation7], %s1108_s25, %s1108_s25, %s1109_s26  }
   0x8   :  { %1100 = dma.done.wait [#allocation4], 384  }
   0x9   :  { %1101 = vsyncadd [#allocation4], 4294966912 }
   0xa   :  { %1102 = dma.done.wait [#allocation7], 6144  }
   0xb   :  { %1103 = vsyncadd [#allocation7], 4294961152  ;;  %v1142_v0 = vld [vmem:[#allocation6 + $0x170] sm:$0xff]  ;;  %v1144_v1 = vld [vmem:[#allocation6 + $0x168] sm:$0xff]  ;;  %vm168_vm0 = vcmask 1040384   ;;  %s920_s5 = sshll.u32 %s1664_s4, 4  ;;  %s921_s5 = int_to_ptr.hbm [resolvable:$true] %s920_s5 }
   0xc   :  { %v1146_v2 = vld [vmem:[#allocation6 + $0x158] sm:$0xff]  ;;  %125 = vmatpush.msra.mxu1 %v1142_v0  ;;  %105 = vmatpush.msra.mxu0 %v1144_v1  ;;  %v1150_v3 = vld [vmem:[#allocation6 + $0x150] sm:$0xff]  ;;  %v1152_v4 = vld [vmem:[#allocation6 + $0x140] sm:$0xff] }
   0xd   :  { %v1154_v5 = vld [vmem:[#allocation6 + $0x138] sm:$0xff]  ;;  %207 = vmatpush.msra.mxu3 %v1144_v1  ;;  %v1159_v6 = vld [vmem:[#allocation6 + $0x128] sm:$0xff]  ;;  %v1161_v7 = vld [vmem:[#allocation6 + $0x120] sm:$0xff] }
   0xe   :  { %126 = vmatpush.msra.mxu1 %v1146_v2  ;;  %106 = vmatpush.msra.mxu0 %v1150_v3  ;;  %v1166_v8 = vld [vmem:[#allocation6 + $0x110] sm:$0xff]  ;;  %v1168_v9 = vld [vmem:[#allocation6 + $0x108] sm:$0xff]  ;;  %v1173_v10 = vld [vmem:[#allocation6 + $0xf8] sm:$0xff] }
   0xf   :  { %208 = vmatpush.msra.mxu3 %v1150_v3  ;;  %v1175_v11 = vld [vmem:[#allocation6 + $0xf0] sm:$0xff]  ;;  %v1177_v12 = vld [vmem:[#allocation6 + $0x178] sm:$0xff]  ;;  %v1182_v13 = vld [vmem:[#allocation6 + $0x160] sm:$0xff] }
  0x10   :  { %127 = vmatpush.msra.mxu1 %v1152_v4  ;;  %107 = vmatpush.msra.mxu0 %v1154_v5  ;;  %v1184_v14 = vld [vmem:[#allocation6 + $0xe0] sm:$0xff]  ;;  %v1186_v15 = vld [vmem:[#allocation6 + $0xd8] sm:$0xff]  ;;  %v1192_v16 = vld [vmem:[#allocation6 + $0x148] sm:$0xff] }
  0x11   :  { %209 = vmatpush.msra.mxu3 %v1154_v5  ;;  %145 = vmatpush.msra.mxu2 %v1177_v12  ;;  %v52_v17 = vld [vmem:[%s1663_s3] sm:$0x1]  ;;  %v1197_v18 = vld [vmem:[#allocation6 + $0xc8] sm:$0xff]  ;;  %v1205_v20 = vld [vmem:[#allocation6 + $0x130] sm:$0xff] }
  0x12   :  { %128 = vmatpush.msra.mxu1 %v1159_v6  ;;  %108 = vmatpush.msra.mxu0 %v1161_v7  ;;  %v1199_v19 = vld [vmem:[#allocation6 + $0xc0] sm:$0xff]  ;;  %53 = vst [vmem:[#allocation2] sm:$0x1] %v52_v17  ;;  %v1207_v21 = vld [vmem:[#allocation6 + $0xb0] sm:$0xff]  ;;  %v1209_v22 = vld [vmem:[#allocation6 + $0xa8] sm:$0xff] }
  0x13   :  { %210 = vmatpush.msra.mxu3 %v1161_v7  ;;  %146 = vmatpush.msra.mxu2 %v1182_v13  ;;  %v1215_v23 = vld [vmem:[#allocation6 + $0x118] sm:$0xff]  ;;  %v1219_v25 = vld [vmem:[#allocation6 + $0x90] sm:$0xff]  ;;  %v1225_v26 = vld [vmem:[#allocation6 + $0x100] sm:$0xff] }
  0x14   :  { %129 = vmatpush.msra.mxu1 %v1166_v8  ;;  %109 = vmatpush.msra.mxu0 %v1168_v9  ;;  %v1217_v24 = vld [vmem:[#allocation6 + $0x98] sm:$0xff]  ;;  %v1227_v27 = vld [vmem:[#allocation6 + $0x80] sm:$0xff]  ;;  %v1235_v29 = vld [vmem:[#allocation6 + $0xe8] sm:$0xff] }
  0x15   :  { %211 = vmatpush.msra.mxu3 %v1168_v9  ;;  %147 = vmatpush.msra.mxu2 %v1192_v16  ;;  %v1229_v28 = vld [vmem:[#allocation6 + $0x78] sm:$0xff]  ;;  %v1237_v30 = vld [vmem:[#allocation6 + $0x68] sm:$0xff]  ;;  %v1239_v31 = vld [vmem:[#allocation6 + $0x60] sm:$0xff] }
  0x16   :  { %130 = vmatpush.msra.mxu1 %v1173_v10  ;;  %110 = vmatpush.msra.mxu0 %v1175_v11  ;;  %v1245_v32 = vld [vmem:[#allocation6 + $0xd0] sm:$0xff]  ;;  %v1249_v34 = vld [vmem:[#allocation6 + $0x48] sm:$0xff]  ;;  %v1255_v35 = vld [vmem:[#allocation6 + $0xb8] sm:$0xff] }
  0x17   :  { %212 = vmatpush.msra.mxu3 %v1175_v11  ;;  %148 = vmatpush.msra.mxu2 %v1205_v20  ;;  %v1247_v33 = vld [vmem:[#allocation6 + $0x50] sm:$0xff]  ;;  %v1257_v36 = vld [vmem:[#allocation6 + $0x38] sm:$0xff]  ;;  %v1265_v38 = vld [vmem:[#allocation6 + $0xa0] sm:$0xff] }
  0x18   :  { %131 = vmatpush.msra.mxu1 %v1184_v14  ;;  %111 = vmatpush.msra.mxu0 %v1186_v15  ;;  %v1259_v37 = vld [vmem:[#allocation6 + $0x30] sm:$0xff]  ;;  %v1267_v39 = vld [vmem:[#allocation6 + $0x20] sm:$0xff]  ;;  %v1269_v40 = vld [vmem:[#allocation6 + $0x18] sm:$0xff] }
  0x19   :  { %213 = vmatpush.msra.mxu3 %v1186_v15  ;;  %149 = vmatpush.msra.mxu2 %v1215_v23  ;;  %1677 = vst [vmem:[#allocation12_spill] sm:$0xff] %v1267_v39  ;;  %v1275_v41 = vld [vmem:[#allocation6 + $0x88] sm:$0xff]  ;;  %v1279_v43 = vld [vmem:[#allocation6] sm:$0xff]  ;;  %v1288_v45 = vld [vmem:[#allocation6 + $0x70] sm:$0xff] }
  0x1a   :  { %132 = vmatpush.msra.mxu1 %v1197_v18  ;;  %112 = vmatpush.msra.mxu0 %v1199_v19  ;;  %1678 = vst [vmem:[#allocation13_spill] sm:$0xff] %v1269_v40  ;;  %v1277_v42 = vld [vmem:[#allocation6 + $0x8] sm:$0xff]  ;;  %v1285_v44 = vld [vmem:[#allocation2] sm:$0x1]  ;;  %v1295_v46 = vld [vmem:[#allocation6 + $0x58] sm:$0xff] }
  0x1b   :  { %214 = vmatpush.msra.mxu3 %v1199_v19  ;;  %150 = vmatpush.msra.mxu2 %v1225_v26  ;;  %1679 = vst [vmem:[#allocation14_spill] sm:$0xff] %v1277_v42  ;;  %v1299_v47 = vld [vmem:[#allocation6 + $0x40] sm:$0xff]  ;;  %v1305_v48 = vld [vmem:[#allocation6 + $0x28] sm:$0xff]  ;;  %v1311_v49 = vld [vmem:[#allocation6 + $0x10] sm:$0xff] }
  0x1c   :  { %133 = vmatpush.msra.mxu1 %v1207_v21  ;;  %113 = vmatpush.msra.mxu0 %v1209_v22  ;;  %1680 = vst [vmem:[#allocation15_spill] sm:$0xff] %v1279_v43  ;;  %v104_v53 = vld [vmem:[#allocation3] ss:$8 sm:$0x7]  ;;  %v1426_v62 = vld [vmem:[%s1662_s2] sm:$0x1] }
  0x1d   :  { %215 = vmatpush.msra.mxu3 %v1209_v22  ;;  %151 = vmatpush.msra.mxu2 %v1235_v29  ;;  %1681 = vst [vmem:[#allocation16_spill] sm:$0xff] %v1305_v48  ;;  %s1110_s2 = smov [#allocation8]  }
  0x1e   :  { %134 = vmatpush.msra.mxu1 %v1217_v24  ;;  %114 = vmatpush.msra.mxu0 %v1219_v25  ;;  %1682 = vst [vmem:[#allocation17_spill] sm:$0xff] %v1311_v49  ;;  %s918_s28 = sshll.u32 %s1110_s2, 4  ;;  %s919_s28 = int_to_ptr.vmem [resolvable:$true] %s918_s28 }
  0x1f   :  { %216 = vmatpush.msra.mxu3 %v1219_v25  ;;  %152 = vmatpush.msra.mxu2 %v1245_v32 }
  0x20   :  { %135 = vmatpush.msra.mxu1 %v1227_v27  ;;  %115 = vmatpush.msra.mxu0 %v1229_v28 }
  0x21   :  { %217 = vmatpush.msra.mxu3 %v1229_v28  ;;  %153 = vmatpush.msra.mxu2 %v1255_v35 }
  0x22   :  { %136 = vmatpush.msra.mxu1 %v1237_v30  ;;  %116 = vmatpush.msra.mxu0 %v1239_v31 }
  0x23   :  { %218 = vmatpush.msra.mxu3 %v1239_v31  ;;  %154 = vmatpush.msra.mxu2 %v1265_v38 }
  0x24   :  { %137 = vmatpush.msra.mxu1 %v1247_v33  ;;  %117 = vmatpush.msra.mxu0 %v1249_v34 }
  0x25   :  { %219 = vmatpush.msra.mxu3 %v1249_v34  ;;  %155 = vmatpush.msra.mxu2 %v1275_v41 }
  0x26   :  { %138 = vmatpush.msra.mxu1 %v1257_v36  ;;  %118 = vmatpush.msra.mxu0 %v1259_v37 }
  0x27   :  { %220 = vmatpush.msra.mxu3 %v1259_v37  ;;  %156 = vmatpush.msra.mxu2 %v1288_v45 }
  0x28   :  { %139 = vmatpush.msra.mxu1 %v1267_v39  ;;  %119 = vmatpush.msra.mxu0 %v1269_v40 }
  0x29   :  { %221 = vmatpush.msra.mxu3 %v1269_v40  ;;  %157 = vmatpush.msra.mxu2 %v1295_v46 }
  0x2a   :  { %140 = vmatpush.msra.mxu1 %v1277_v42  ;;  %120 = vmatpush.msra.mxu0 %v1279_v43 }
  0x2b   :  { %141 = vmatmul.f32.vlgmr.msra.gmra.mxu1 %v1285_v44  ;;  %121 = vmatmul.f32.vlgmr.msra.gmra.mxu0 %v1285_v44 }
  0x2c   :  { %227 = vmatpush.msrb.mxu0 %v1142_v0  ;;  %247 = vmatpush.msrb.mxu1 %v1177_v12 }
  0x2d   :  { %222 = vmatpush.msra.mxu3 %v1279_v43  ;;  %158 = vmatpush.msra.mxu2 %v1299_v47 }
  0x2e   :  { %228 = vmatpush.msrb.mxu0 %v1146_v2  ;;  %248 = vmatpush.msrb.mxu1 %v1182_v13 }
  0x2f   :  { %328 = vmatpush.msrb.mxu3 %v1142_v0  ;;  %159 = vmatpush.msra.mxu2 %v1305_v48 }
  0x30   :  { %229 = vmatpush.msrb.mxu0 %v1152_v4  ;;  %249 = vmatpush.msrb.mxu1 %v1192_v16 }
  0x31   :  { %329 = vmatpush.msrb.mxu3 %v1146_v2  ;;  %160 = vmatpush.msra.mxu2 %v1311_v49 }
  0x32   :  { %230 = vmatpush.msrb.mxu0 %v1159_v6  ;;  %250 = vmatpush.msrb.mxu1 %v1205_v20 }
  0x33   :  { %330 = vmatpush.msrb.mxu3 %v1152_v4  ;;  %161 = vmatmul.f32.vlgmr.msra.gmra.mxu2 %v1285_v44 }
  0x34   :  { %231 = vmatpush.msrb.mxu0 %v1166_v8  ;;  %251 = vmatpush.msrb.mxu1 %v1215_v23 }
  0x35   :  { %308 = vmatpush.msrb.mxu2 %v1144_v1  ;;  %331 = vmatpush.msrb.mxu3 %v1159_v6 }
  0x36   :  { %232 = vmatpush.msrb.mxu0 %v1173_v10  ;;  %252 = vmatpush.msrb.mxu1 %v1225_v26 }
  0x37   :  { %309 = vmatpush.msrb.mxu2 %v1150_v3  ;;  %332 = vmatpush.msrb.mxu3 %v1166_v8 }
  0x38   :  { %233 = vmatpush.msrb.mxu0 %v1184_v14  ;;  %253 = vmatpush.msrb.mxu1 %v1235_v29 }
  0x39   :  { %310 = vmatpush.msrb.mxu2 %v1154_v5  ;;  %333 = vmatpush.msrb.mxu3 %v1173_v10 }
  0x3a   :  { %234 = vmatpush.msrb.mxu0 %v1197_v18  ;;  %254 = vmatpush.msrb.mxu1 %v1245_v32 }
  0x3b   :  { %311 = vmatpush.msrb.mxu2 %v1161_v7  ;;  %334 = vmatpush.msrb.mxu3 %v1184_v14 }
  0x3c   :  { %235 = vmatpush.msrb.mxu0 %v1207_v21  ;;  %255 = vmatpush.msrb.mxu1 %v1255_v35 }
  0x3d   :  { %312 = vmatpush.msrb.mxu2 %v1168_v9  ;;  %335 = vmatpush.msrb.mxu3 %v1197_v18 }
  0x3e   :  { %236 = vmatpush.msrb.mxu0 %v1217_v24  ;;  %256 = vmatpush.msrb.mxu1 %v1265_v38 }
  0x3f   :  { %313 = vmatpush.msrb.mxu2 %v1175_v11  ;;  %336 = vmatpush.msrb.mxu3 %v1207_v21 }
  0x40   :  { %237 = vmatpush.msrb.mxu0 %v1227_v27  ;;  %257 = vmatpush.msrb.mxu1 %v1275_v41 }
  0x41   :  { %314 = vmatpush.msrb.mxu2 %v1186_v15  ;;  %337 = vmatpush.msrb.mxu3 %v1217_v24 }
  0x42   :  { %238 = vmatpush.msrb.mxu0 %v1237_v30  ;;  %258 = vmatpush.msrb.mxu1 %v1288_v45 }
  0x43   :  { %315 = vmatpush.msrb.mxu2 %v1199_v19  ;;  %338 = vmatpush.msrb.mxu3 %v1227_v27 }
  0x44   :  { %239 = vmatpush.msrb.mxu0 %v1247_v33  ;;  %259 = vmatpush.msrb.mxu1 %v1295_v46 }
  0x45   :  { %316 = vmatpush.msrb.mxu2 %v1209_v22  ;;  %339 = vmatpush.msrb.mxu3 %v1237_v30 }
  0x46   :  { %240 = vmatpush.msrb.mxu0 %v1257_v36  ;;  %260 = vmatpush.msrb.mxu1 %v1299_v47 }
  0x47   :  { %317 = vmatpush.msrb.mxu2 %v1219_v25  ;;  %340 = vmatpush.msrb.mxu3 %v1247_v33 }
  0x48   :  { %241 = vmatpush.msrb.mxu0 %v1267_v39  ;;  %261 = vmatpush.msrb.mxu1 %v1305_v48 }
  0x49   :  { %318 = vmatpush.msrb.mxu2 %v1229_v28  ;;  %341 = vmatpush.msrb.mxu3 %v1257_v36 }
  0x4a   :  { %242 = vmatpush.msrb.mxu0 %v1277_v42  ;;  %262 = vmatpush.msrb.mxu1 %v1311_v49 }
  0x4b   :  { %319 = vmatpush.msrb.mxu2 %v1239_v31  ;;  %342 = vmatpush.msrb.mxu3 %v1267_v39 }
  0x4c   :  { %348 = vmatpush.msra.mxu0 %v1177_v12  ;;  %409 = vmatpush.msra.mxu1 %v1144_v1 }
  0x4d   :  { %320 = vmatpush.msrb.mxu2 %v1249_v34  ;;  %343 = vmatpush.msrb.mxu3 %v1277_v42 }
  0x4e   :  { %349 = vmatpush.msra.mxu0 %v1182_v13  ;;  %410 = vmatpush.msra.mxu1 %v1150_v3 }
  0x4f   :  { %321 = vmatpush.msrb.mxu2 %v1259_v37 }
  0x50   :  { %350 = vmatpush.msra.mxu0 %v1192_v16  ;;  %411 = vmatpush.msra.mxu1 %v1154_v5 }
  0x51   :  { %322 = vmatpush.msrb.mxu2 %v1269_v40 }
  0x52   :  { %351 = vmatpush.msra.mxu0 %v1205_v20  ;;  %412 = vmatpush.msra.mxu1 %v1161_v7 }
  0x53   :  { %323 = vmatpush.msrb.mxu2 %v1279_v43 }
  0x54   :  { %352 = vmatpush.msra.mxu0 %v1215_v23  ;;  %413 = vmatpush.msra.mxu1 %v1168_v9 }
  0x55   :  { %429 = vmatpush.msra.mxu2 %v1142_v0 }
  0x56   :  { %353 = vmatpush.msra.mxu0 %v1225_v26  ;;  %414 = vmatpush.msra.mxu1 %v1175_v11 }
  0x57   :  { %430 = vmatpush.msra.mxu2 %v1146_v2 }
  0x58   :  { %354 = vmatpush.msra.mxu0 %v1235_v29  ;;  %415 = vmatpush.msra.mxu1 %v1186_v15 }
  0x59   :  { %431 = vmatpush.msra.mxu2 %v1152_v4 }
  0x5a   :  { %355 = vmatpush.msra.mxu0 %v1245_v32  ;;  %416 = vmatpush.msra.mxu1 %v1199_v19 }
  0x5b   :  { %432 = vmatpush.msra.mxu2 %v1159_v6 }
  0x5c   :  { %356 = vmatpush.msra.mxu0 %v1255_v35  ;;  %417 = vmatpush.msra.mxu1 %v1209_v22 }
  0x5d   :  { %433 = vmatpush.msra.mxu2 %v1166_v8 }
  0x5e   :  { %357 = vmatpush.msra.mxu0 %v1265_v38  ;;  %418 = vmatpush.msra.mxu1 %v1219_v25 }
  0x5f   :  { %434 = vmatpush.msra.mxu2 %v1173_v10 }
  0x60   :  { %358 = vmatpush.msra.mxu0 %v1275_v41  ;;  %419 = vmatpush.msra.mxu1 %v1229_v28 }
  0x61   :  { %435 = vmatpush.msra.mxu2 %v1184_v14 }
  0x62   :  { %359 = vmatpush.msra.mxu0 %v1288_v45  ;;  %420 = vmatpush.msra.mxu1 %v1239_v31 }
  0x63   :  { %436 = vmatpush.msra.mxu2 %v1197_v18 }
  0x64   :  { %360 = vmatpush.msra.mxu0 %v1295_v46  ;;  %421 = vmatpush.msra.mxu1 %v1249_v34 }
  0x65   :  { %437 = vmatpush.msra.mxu2 %v1207_v21 }
  0x66   :  { %361 = vmatpush.msra.mxu0 %v1299_v47  ;;  %422 = vmatpush.msra.mxu1 %v1259_v37 }
  0x67   :  { %438 = vmatpush.msra.mxu2 %v1217_v24 }
  0x68   :  { %362 = vmatpush.msra.mxu0 %v1305_v48  ;;  %423 = vmatpush.msra.mxu1 %v1269_v40 }
  0x69   :  { %439 = vmatpush.msra.mxu2 %v1227_v27 }
  0x6a   :  { %363 = vmatpush.msra.mxu0 %v1311_v49  ;;  %424 = vmatpush.msra.mxu1 %v1279_v43 }
  0x6b   :  { %440 = vmatpush.msra.mxu2 %v1237_v30 }
  0x6d   :  { %441 = vmatpush.msra.mxu2 %v1247_v33 }
  0x6f   :  { %442 = vmatpush.msra.mxu2 %v1257_v36 }
  0x71   :  { %443 = vmatpush.msra.mxu2 %v1267_v39 }
  0x73   :  { %444 = vmatpush.msra.mxu2 %v1277_v42 }
  0xa8   :  { %v142_v50 = vpop.f32.mrf.mxu1  ;;  %v122_v51 = vpop.f32.mrf.mxu0 }
  0xa9   :  { %v167_v52 = vrot.slane %v142_v50, 7 }
  0xab   :  { %v169_v54 = vsel %vm168_vm0, %v122_v51, %v167_v52 }
  0xac   :  { %v171_v55 = vadd.f32 %v169_v54, %v104_v53 }
  0xae   :  { %v931_v56 = vmul.f32 -1.442695, %v171_v55  ;;  %v194_v55 = vrot.slane %v104_v53, 2 }
  0xb0   :  { %944 = vpow2.f32 %v931_v56 }
  0xb6   :  { %v945_v57 = vpop.eup %944  ;;  %v162_v63 = vpop.f32.mrf.mxu2 }
  0xb7   :  { %v175_v58 = vadd.f32 1.0, %v945_v57  ;;  %v191_v52 = vadd.f32 %v162_v63, %v1426_v62 }
  0xb9   :  { %946 = vrcp.f32 %v175_v58  ;;  %v187_v17 = vand.u32 2147483648, %v175_v58  ;;  %v185_v42 = vand.u32 2147483647, %v175_v58  ;;  %vm181_vm2 = vweird.f32 %v175_v58 }
  0xbb   :  { %v188_v54 = vor.u32 1.1754944e-38, %v187_v17  ;;  %vm186_vm4 = vcmp.eq.f32.partialorder %v185_v42, 8.507059e+37  ;;  %v1685_v42 = vld [vmem:[#allocation12_spill] sm:$0xff] }
  0xbf   :  { %v947_v59 = vpop.eup %946 }
  0xc0   :  { %v177_v60 = vmul.f32 %v947_v59, %v175_v58  ;;  %vm182_vm1 = vweird.f32 %v947_v59 }
  0xc1   :  { %vm183_vm3 = vmor %vm181_vm2, %vm182_vm1 }
  0xc2   :  { %v178_v61 = vsub.f32 1.0, %v177_v60 }
  0xc4   :  { %v179_v50 = vmul.f32 %v947_v59, %v178_v61 }
  0xc6   :  { %v180_v51 = vadd.f32 %v947_v59, %v179_v50 }
  0xc8   :  { %v184_v56 = vsel %vm183_vm3, %v947_v59, %v180_v51  ;;  %v206_v59 = vld [vmem:[#allocation3 + $0x1] ss:$8 sm:$0x7] }
  0xc9   :  { %v189_v57 = vsel %vm186_vm4, %v188_v54, %v184_v56 }
  0xca   :  { %v192_v60 = vmul.f32 %v191_v52, %v189_v57  ;;  %v200_v40 = vrot.slane %v189_v57, 1 }
  0xcc   :  { %v196_v43 = vadd.f32 %v194_v55, %v192_v60 }
  0xce   :  { %948 = vtanh.f32 %v196_v43  ;;  %v1686_v43 = vld [vmem:[#allocation17_spill] sm:$0xff] }
  0xd4   :  { %v949_v49 = vpop.eup %948 }
  0xd5   :  { %v198_v39 = vsub.f32 %v1285_v44, %v949_v49  ;;  %v1687_v44 = vld [vmem:[#allocation15_spill] sm:$0xff] }
  0xd7   :  { %v202_v61 = vmul.f32 %v200_v40, %v198_v39  ;;  %v1683_v39 = vld [vmem:[#allocation16_spill] sm:$0xff]  ;;  %v1684_v40 = vld [vmem:[#allocation13_spill] sm:$0xff] }
  0xd9   :  { %v1430_v48 = vadd.f32 %v949_v49, %v202_v61  ;;  %v1688_v49 = vld [vmem:[#allocation14_spill] sm:$0xff] }
  0xdb   :  { %204 = vst [vmem:[#allocation8] sm:$0x1] %v1430_v48  ;;  %223 = vmatmul.f32.vlgmr.msra.gmra.mxu3 %v1430_v48  ;;  %243 = vmatmul.f32.vlgmr.msrb.gmra.mxu0 %v1430_v48 }
  0xdc   :  { %263 = vmatmul.f32.vlgmr.msrb.gmra.mxu1 %v1430_v48  ;;  %449 = vmatpush.msra.mxu3 %v1177_v12 }
  0xdd   :  { %510 = vmatpush.msrb.mxu0 %v1144_v1  ;;  %530 = vmatpush.msrb.mxu1 %v1142_v0 }
  0xde   :  { %450 = vmatpush.msra.mxu3 %v1182_v13 }
  0xdf   :  { %511 = vmatpush.msrb.mxu0 %v1150_v3  ;;  %531 = vmatpush.msrb.mxu1 %v1146_v2 }
  0xe0   :  { %451 = vmatpush.msra.mxu3 %v1192_v16 }
  0xe1   :  { %512 = vmatpush.msrb.mxu0 %v1154_v5  ;;  %532 = vmatpush.msrb.mxu1 %v1152_v4 }
  0xe2   :  { %452 = vmatpush.msra.mxu3 %v1205_v20 }
  0xe3   :  { %513 = vmatpush.msrb.mxu0 %v1161_v7  ;;  %533 = vmatpush.msrb.mxu1 %v1159_v6 }
  0xe4   :  { %453 = vmatpush.msra.mxu3 %v1215_v23 }
  0xe5   :  { %514 = vmatpush.msrb.mxu0 %v1168_v9  ;;  %534 = vmatpush.msrb.mxu1 %v1166_v8 }
  0xe6   :  { %454 = vmatpush.msra.mxu3 %v1225_v26 }
  0xe7   :  { %515 = vmatpush.msrb.mxu0 %v1175_v11  ;;  %535 = vmatpush.msrb.mxu1 %v1173_v10 }
  0xe8   :  { %455 = vmatpush.msra.mxu3 %v1235_v29 }
  0xe9   :  { %516 = vmatpush.msrb.mxu0 %v1186_v15  ;;  %536 = vmatpush.msrb.mxu1 %v1184_v14 }
  0xea   :  { %456 = vmatpush.msra.mxu3 %v1245_v32 }
  0xeb   :  { %517 = vmatpush.msrb.mxu0 %v1199_v19  ;;  %537 = vmatpush.msrb.mxu1 %v1197_v18 }
  0xec   :  { %457 = vmatpush.msra.mxu3 %v1255_v35 }
  0xed   :  { %518 = vmatpush.msrb.mxu0 %v1209_v22  ;;  %538 = vmatpush.msrb.mxu1 %v1207_v21 }
  0xee   :  { %458 = vmatpush.msra.mxu3 %v1265_v38 }
  0xef   :  { %519 = vmatpush.msrb.mxu0 %v1219_v25  ;;  %539 = vmatpush.msrb.mxu1 %v1217_v24 }
  0xf0   :  { %459 = vmatpush.msra.mxu3 %v1275_v41 }
  0xf1   :  { %520 = vmatpush.msrb.mxu0 %v1229_v28  ;;  %540 = vmatpush.msrb.mxu1 %v1227_v27 }
  0xf2   :  { %460 = vmatpush.msra.mxu3 %v1288_v45 }
  0xf3   :  { %521 = vmatpush.msrb.mxu0 %v1239_v31  ;;  %541 = vmatpush.msrb.mxu1 %v1237_v30 }
  0xf4   :  { %461 = vmatpush.msra.mxu3 %v1295_v46 }
  0xf5   :  { %522 = vmatpush.msrb.mxu0 %v1249_v34  ;;  %542 = vmatpush.msrb.mxu1 %v1247_v33 }
  0xf6   :  { %462 = vmatpush.msra.mxu3 %v1299_v47 }
  0xf7   :  { %523 = vmatpush.msrb.mxu0 %v1259_v37  ;;  %543 = vmatpush.msrb.mxu1 %v1257_v36 }
  0xf8   :  { %463 = vmatpush.msra.mxu3 %v1683_v39 }
  0xf9   :  { %524 = vmatpush.msrb.mxu0 %v1684_v40  ;;  %544 = vmatpush.msrb.mxu1 %v1685_v42 }
  0xfa   :  { %464 = vmatpush.msra.mxu3 %v1686_v43 }
  0xfb   :  { %525 = vmatpush.msrb.mxu0 %v1687_v44  ;;  %545 = vmatpush.msrb.mxu1 %v1688_v49 }
 0x158   :  { %v244_v53 = vpop.f32.mrf.mxu0 }
 0x159   :  { %v269_v58 = vrot.slane %v244_v53, 7  ;;  %v264_v49 = vpop.f32.mrf.mxu1 }
 0x15e   :  { %v224_v63 = vpop.f32.mrf.mxu3 }
 0x15f   :  { %v270_v17 = vsel %vm168_vm0, %v224_v63, %v269_v58  ;;  %v292_v58 = vadd.f32 %v264_v49, %v1426_v62  ;;  %v1694_v49 = vld [vmem:[#allocation14_spill] sm:$0xff] }
 0x160   :  { %v272_v50 = vadd.f32 %v270_v17, %v206_v59  ;;  %v295_v17 = vrot.slane %v206_v59, 2 }
 0x162   :  { %v932_v51 = vmul.f32 -1.442695, %v272_v50 }
 0x164   :  { %950 = vpow2.f32 %v932_v51 }
 0x16a   :  { %v951_v52 = vpop.eup %950 }
 0x16b   :  { %v276_v54 = vadd.f32 1.0, %v951_v52 }
 0x16d   :  { %952 = vrcp.f32 %v276_v54  ;;  %v288_v60 = vand.u32 2147483648, %v276_v54  ;;  %v286_v44 = vand.u32 2147483647, %v276_v54  ;;  %vm282_vm6 = vweird.f32 %v276_v54 }
 0x16f   :  { %v289_v53 = vor.u32 1.1754944e-38, %v288_v60  ;;  %vm287_vm8 = vcmp.eq.f32.partialorder %v286_v44, 8.507059e+37  ;;  %v1693_v44 = vld [vmem:[#allocation15_spill] sm:$0xff] }
 0x173   :  { %v953_v55 = vpop.eup %952 }
 0x174   :  { %v278_v56 = vmul.f32 %v953_v55, %v276_v54  ;;  %vm283_vm5 = vweird.f32 %v953_v55  ;;  %v307_v54 = vld [vmem:[#allocation3 + $0x2] ss:$8 sm:$0x7] }
 0x175   :  { %vm284_vm7 = vmor %vm282_vm6, %vm283_vm5 }
 0x176   :  { %v279_v57 = vsub.f32 1.0, %v278_v56 }
 0x178   :  { %v280_v61 = vmul.f32 %v953_v55, %v279_v57 }
 0x17a   :  { %v281_v43 = vadd.f32 %v953_v55, %v280_v61 }
 0x17c   :  { %v285_v63 = vsel %vm284_vm7, %v953_v55, %v281_v43  ;;  %v1692_v43 = vld [vmem:[#allocation17_spill] sm:$0xff] }
 0x17d   :  { %v290_v50 = vsel %vm287_vm8, %v289_v53, %v285_v63 }
 0x17e   :  { %v293_v51 = vmul.f32 %v292_v58, %v290_v50  ;;  %v301_v57 = vrot.slane %v290_v50, 1 }
 0x180   :  { %v297_v52 = vadd.f32 %v295_v17, %v293_v51 }
 0x182   :  { %954 = vtanh.f32 %v297_v52 }
 0x188   :  { %v955_v42 = vpop.eup %954 }
 0x189   :  { %v299_v56 = vsub.f32 %v1430_v48, %v955_v42  ;;  %v1689_v48 = vld [vmem:[#allocation16_spill] sm:$0xff] }
 0x18b   :  { %v303_v40 = vmul.f32 %v301_v57, %v299_v56 }
 0x18d   :  { %v1487_v39 = vadd.f32 %v955_v42, %v303_v40  ;;  %v1690_v40 = vld [vmem:[#allocation13_spill] sm:$0xff]  ;;  %v1691_v42 = vld [vmem:[#allocation12_spill] sm:$0xff] }
 0x18f   :  { %305 = vst [vmem:[#allocation8 + $0x1] sm:$0x1] %v1487_v39  ;;  %324 = vmatmul.f32.vlgmr.msrb.gmra.mxu2 %v1487_v39  ;;  %344 = vmatmul.f32.vlgmr.msrb.gmra.mxu3 %v1487_v39 }
 0x190   :  { %364 = vmatmul.f32.vlgmr.msra.gmra.mxu0 %v1487_v39  ;;  %550 = vmatpush.msrb.mxu2 %v1177_v12 }
 0x191   :  { %611 = vmatpush.msrb.mxu3 %v1144_v1  ;;  %631 = vmatpush.msra.mxu0 %v1142_v0 }
 0x192   :  { %551 = vmatpush.msrb.mxu2 %v1182_v13 }
 0x193   :  { %612 = vmatpush.msrb.mxu3 %v1150_v3  ;;  %632 = vmatpush.msra.mxu0 %v1146_v2 }
 0x194   :  { %552 = vmatpush.msrb.mxu2 %v1192_v16 }
 0x195   :  { %613 = vmatpush.msrb.mxu3 %v1154_v5  ;;  %633 = vmatpush.msra.mxu0 %v1152_v4 }
 0x196   :  { %553 = vmatpush.msrb.mxu2 %v1205_v20 }
 0x197   :  { %614 = vmatpush.msrb.mxu3 %v1161_v7  ;;  %634 = vmatpush.msra.mxu0 %v1159_v6 }
 0x198   :  { %554 = vmatpush.msrb.mxu2 %v1215_v23 }
 0x199   :  { %615 = vmatpush.msrb.mxu3 %v1168_v9  ;;  %635 = vmatpush.msra.mxu0 %v1166_v8 }
 0x19a   :  { %555 = vmatpush.msrb.mxu2 %v1225_v26 }
 0x19b   :  { %616 = vmatpush.msrb.mxu3 %v1175_v11  ;;  %636 = vmatpush.msra.mxu0 %v1173_v10 }
 0x19c   :  { %556 = vmatpush.msrb.mxu2 %v1235_v29 }
 0x19d   :  { %617 = vmatpush.msrb.mxu3 %v1186_v15  ;;  %637 = vmatpush.msra.mxu0 %v1184_v14 }
 0x19e   :  { %557 = vmatpush.msrb.mxu2 %v1245_v32 }
 0x19f   :  { %618 = vmatpush.msrb.mxu3 %v1199_v19  ;;  %638 = vmatpush.msra.mxu0 %v1197_v18 }
 0x1a0   :  { %558 = vmatpush.msrb.mxu2 %v1255_v35 }
 0x1a1   :  { %619 = vmatpush.msrb.mxu3 %v1209_v22  ;;  %639 = vmatpush.msra.mxu0 %v1207_v21 }
 0x1a2   :  { %559 = vmatpush.msrb.mxu2 %v1265_v38 }
 0x1a3   :  { %620 = vmatpush.msrb.mxu3 %v1219_v25  ;;  %640 = vmatpush.msra.mxu0 %v1217_v24 }
 0x1a4   :  { %560 = vmatpush.msrb.mxu2 %v1275_v41 }
 0x1a5   :  { %621 = vmatpush.msrb.mxu3 %v1229_v28  ;;  %641 = vmatpush.msra.mxu0 %v1227_v27 }
 0x1a6   :  { %561 = vmatpush.msrb.mxu2 %v1288_v45 }
 0x1a7   :  { %622 = vmatpush.msrb.mxu3 %v1239_v31  ;;  %642 = vmatpush.msra.mxu0 %v1237_v30 }
 0x1a8   :  { %562 = vmatpush.msrb.mxu2 %v1295_v46 }
 0x1a9   :  { %623 = vmatpush.msrb.mxu3 %v1249_v34  ;;  %643 = vmatpush.msra.mxu0 %v1247_v33 }
 0x1aa   :  { %563 = vmatpush.msrb.mxu2 %v1299_v47 }
 0x1ab   :  { %624 = vmatpush.msrb.mxu3 %v1259_v37  ;;  %644 = vmatpush.msra.mxu0 %v1257_v36 }
 0x1ac   :  { %564 = vmatpush.msrb.mxu2 %v1689_v48 }
 0x1ad   :  { %625 = vmatpush.msrb.mxu3 %v1690_v40  ;;  %645 = vmatpush.msra.mxu0 %v1691_v42 }
 0x1ae   :  { %565 = vmatpush.msrb.mxu2 %v1692_v43 }
 0x1af   :  { %626 = vmatpush.msrb.mxu3 %v1693_v44  ;;  %646 = vmatpush.msra.mxu0 %v1694_v49 }
 0x20d   :  { %v365_v49 = vpop.f32.mrf.mxu0 }
 0x212   :  { %v345_v59 = vpop.f32.mrf.mxu3  ;;  %v325_v60 = vpop.f32.mrf.mxu2 }
 0x213   :  { %v370_v55 = vrot.slane %v345_v59, 7 }
 0x215   :  { %v371_v61 = vsel %vm168_vm0, %v325_v60, %v370_v55  ;;  %v393_v55 = vadd.f32 %v365_v49, %v1426_v62 }
 0x216   :  { %v373_v53 = vadd.f32 %v371_v61, %v307_v54  ;;  %v396_v61 = vrot.slane %v307_v54, 2 }
 0x218   :  { %v933_v58 = vmul.f32 -1.442695, %v373_v53 }
 0x21a   :  { %956 = vpow2.f32 %v933_v58 }
 0x220   :  { %v957_v63 = vpop.eup %956 }
 0x221   :  { %v377_v17 = vadd.f32 1.0, %v957_v63 }
 0x223   :  { %958 = vrcp.f32 %v377_v17  ;;  %v389_v56 = vand.u32 2147483648, %v377_v17  ;;  %v387_v44 = vand.u32 2147483647, %v377_v17  ;;  %vm383_vm10 = vweird.f32 %v377_v17 }
 0x225   :  { %v390_v59 = vor.u32 1.1754944e-38, %v389_v56  ;;  %vm388_vm12 = vcmp.eq.f32.partialorder %v387_v44, 8.507059e+37 }
 0x229   :  { %v959_v50 = vpop.eup %958 }
 0x22a   :  { %v379_v51 = vmul.f32 %v959_v50, %v377_v17  ;;  %vm384_vm9 = vweird.f32 %v959_v50 }
 0x22b   :  { %vm385_vm11 = vmor %vm383_vm10, %vm384_vm9 }
 0x22c   :  { %v380_v52 = vsub.f32 1.0, %v379_v51 }
 0x22e   :  { %v381_v57 = vmul.f32 %v959_v50, %v380_v52 }
 0x230   :  { %v382_v43 = vadd.f32 %v959_v50, %v381_v57 }
 0x232   :  { %v386_v60 = vsel %vm385_vm11, %v959_v50, %v382_v43 }
 0x233   :  { %v391_v53 = vsel %vm388_vm12, %v390_v59, %v386_v60  ;;  %v1607_v60 = vld [vmem:[#allocation6 + $0x178] sm:$0xff] }
 0x234   :  { %v394_v58 = vmul.f32 %v393_v55, %v391_v53  ;;  %v402_v51 = vrot.slane %v391_v53, 1  ;;  %v994_v53 = vld [vmem:[#allocation6 + $0x170] sm:$0xff] }
 0x236   :  { %v398_v63 = vadd.f32 %v396_v61, %v394_v58  ;;  %v993_v61 = vld [vmem:[#allocation6 + $0x168] sm:$0xff]  ;;  %v996_v58 = vld [vmem:[#allocation6 + $0x150] sm:$0xff] }
 0x238   :  { %960 = vtanh.f32 %v398_v63  ;;  %v997_v63 = vld [vmem:[#allocation6 + $0x158] sm:$0xff] }
 0x23e   :  { %v961_v42 = vpop.eup %960 }
 0x23f   :  { %v400_v52 = vsub.f32 %v1487_v39, %v961_v42 }
 0x241   :  { %v404_v40 = vmul.f32 %v402_v51, %v400_v52  ;;  %v998_v51 = vld [vmem:[#allocation6 + $0x138] sm:$0xff]  ;;  %v999_v52 = vld [vmem:[#allocation6 + $0x140] sm:$0xff] }
 0x243   :  { %v1544_v48 = vadd.f32 %v961_v42, %v404_v40 }
 0x245   :  { %406 = vst [vmem:[#allocation8 + $0x2] sm:$0x1] %v1544_v48  ;;  %425 = vmatmul.f32.vlgmr.msra.gmra.mxu1 %v1544_v48  ;;  %445 = vmatmul.f32.vlgmr.msra.gmra.mxu2 %v1544_v48 }
 0x246   :  { %465 = vmatmul.f32.vlgmr.msra.gmra.mxu3 %v1544_v48  ;;  %651 = vmatpush.msra.mxu1 %v1177_v12 }
 0x247   :  { %712 = vmatpush.msra.mxu2 %v1144_v1  ;;  %732 = vmatpush.msra.mxu3 %v1142_v0  ;;  %v1695_v0 = vld [vmem:[#allocation16_spill] sm:$0xff]  ;;  %v1696_v1 = vld [vmem:[#allocation13_spill] sm:$0xff] }
 0x248   :  { %652 = vmatpush.msra.mxu1 %v1182_v13 }
 0x249   :  { %713 = vmatpush.msra.mxu2 %v1150_v3  ;;  %733 = vmatpush.msra.mxu3 %v1146_v2  ;;  %v1697_v2 = vld [vmem:[#allocation12_spill] sm:$0xff]  ;;  %v1698_v3 = vld [vmem:[#allocation17_spill] sm:$0xff] }
 0x24a   :  { %653 = vmatpush.msra.mxu1 %v1192_v16 }
 0x24b   :  { %714 = vmatpush.msra.mxu2 %v1154_v5  ;;  %734 = vmatpush.msra.mxu3 %v1152_v4  ;;  %v1699_v4 = vld [vmem:[#allocation15_spill] sm:$0xff]  ;;  %v1700_v5 = vld [vmem:[#allocation14_spill] sm:$0xff] }
 0x24c   :  { %654 = vmatpush.msra.mxu1 %v1205_v20 }
 0x24d   :  { %715 = vmatpush.msra.mxu2 %v1161_v7  ;;  %735 = vmatpush.msra.mxu3 %v1159_v6  ;;  %v408_v7 = vld [vmem:[#allocation3 + $0x3] ss:$8 sm:$0x7] }
 0x24e   :  { %655 = vmatpush.msra.mxu1 %v1215_v23  ;;  %v497_v44 = vrot.slane %v408_v7, 2 }
 0x24f   :  { %716 = vmatpush.msra.mxu2 %v1168_v9  ;;  %736 = vmatpush.msra.mxu3 %v1166_v8 }
 0x250   :  { %656 = vmatpush.msra.mxu1 %v1225_v26 }
 0x251   :  { %717 = vmatpush.msra.mxu2 %v1175_v11  ;;  %737 = vmatpush.msra.mxu3 %v1173_v10 }
 0x252   :  { %657 = vmatpush.msra.mxu1 %v1235_v29 }
 0x253   :  { %718 = vmatpush.msra.mxu2 %v1186_v15  ;;  %738 = vmatpush.msra.mxu3 %v1184_v14 }
 0x254   :  { %658 = vmatpush.msra.mxu1 %v1245_v32 }
 0x255   :  { %719 = vmatpush.msra.mxu2 %v1199_v19  ;;  %739 = vmatpush.msra.mxu3 %v1197_v18 }
 0x256   :  { %659 = vmatpush.msra.mxu1 %v1255_v35 }
 0x257   :  { %720 = vmatpush.msra.mxu2 %v1209_v22  ;;  %740 = vmatpush.msra.mxu3 %v1207_v21 }
 0x258   :  { %660 = vmatpush.msra.mxu1 %v1265_v38 }
 0x259   :  { %721 = vmatpush.msra.mxu2 %v1219_v25  ;;  %741 = vmatpush.msra.mxu3 %v1217_v24 }
 0x25a   :  { %661 = vmatpush.msra.mxu1 %v1275_v41 }
 0x25b   :  { %722 = vmatpush.msra.mxu2 %v1229_v28  ;;  %742 = vmatpush.msra.mxu3 %v1227_v27 }
 0x25c   :  { %662 = vmatpush.msra.mxu1 %v1288_v45 }
 0x25d   :  { %723 = vmatpush.msra.mxu2 %v1239_v31  ;;  %743 = vmatpush.msra.mxu3 %v1237_v30 }
 0x25e   :  { %663 = vmatpush.msra.mxu1 %v1295_v46 }
 0x25f   :  { %724 = vmatpush.msra.mxu2 %v1249_v34  ;;  %744 = vmatpush.msra.mxu3 %v1247_v33 }
 0x260   :  { %664 = vmatpush.msra.mxu1 %v1299_v47 }
 0x261   :  { %725 = vmatpush.msra.mxu2 %v1259_v37  ;;  %745 = vmatpush.msra.mxu3 %v1257_v36 }
 0x262   :  { %665 = vmatpush.msra.mxu1 %v1695_v0 }
 0x263   :  { %726 = vmatpush.msra.mxu2 %v1696_v1  ;;  %746 = vmatpush.msra.mxu3 %v1697_v2 }
 0x264   :  { %666 = vmatpush.msra.mxu1 %v1698_v3 }
 0x265   :  { %727 = vmatpush.msra.mxu2 %v1699_v4  ;;  %747 = vmatpush.msra.mxu3 %v1700_v5 }
 0x2c2   :  { %v426_v9 = vpop.f32.mrf.mxu1 }
 0x2c8   :  { %v446_v6 = vpop.f32.mrf.mxu2 }
 0x2c9   :  { %v471_v8 = vrot.slane %v446_v6, 7  ;;  %v466_v25 = vpop.f32.mrf.mxu3  ;;  %v1000_v6 = vld [vmem:[#allocation6 + $0x120] sm:$0xff] }
 0x2ca   :  { %v494_v43 = vadd.f32 %v466_v25, %v1426_v62 }
 0x2cb   :  { %v472_v10 = vsel %vm168_vm0, %v426_v9, %v471_v8  ;;  %v1002_v8 = vld [vmem:[#allocation6 + $0x108] sm:$0xff]  ;;  %v1003_v9 = vld [vmem:[#allocation6 + $0x110] sm:$0xff] }
 0x2cc   :  { %v474_v11 = vadd.f32 %v472_v10, %v408_v7  ;;  %v1001_v7 = vld [vmem:[#allocation6 + $0x128] sm:$0xff]  ;;  %v1004_v10 = vld [vmem:[#allocation6 + $0xf0] sm:$0xff] }
 0x2ce   :  { %v934_v12 = vmul.f32 -1.442695, %v474_v11  ;;  %v1006_v11 = vld [vmem:[#allocation6 + $0xd8] sm:$0xff] }
 0x2d0   :  { %962 = vpow2.f32 %v934_v12  ;;  %v1008_v12 = vld [vmem:[#allocation6 + $0xc0] sm:$0xff] }
 0x2d6   :  { %v963_v13 = vpop.eup %962 }
 0x2d7   :  { %v478_v14 = vadd.f32 1.0, %v963_v13  ;;  %v1010_v13 = vld [vmem:[#allocation6 + $0xa8] sm:$0xff] }
 0x2d9   :  { %964 = vrcp.f32 %v478_v14  ;;  %v490_v21 = vand.u32 2147483648, %v478_v14  ;;  %v488_v24 = vand.u32 2147483647, %v478_v14  ;;  %vm484_vm14 = vweird.f32 %v478_v14 }
 0x2db   :  { %v491_v40 = vor.u32 1.1754944e-38, %v490_v21  ;;  %vm489_vm1 = vcmp.eq.f32.partialorder %v488_v24, 8.507059e+37 }
 0x2df   :  { %v965_v15 = vpop.eup %964 }
 0x2e0   :  { %v480_v18 = vmul.f32 %v965_v15, %v478_v14  ;;  %vm485_vm13 = vweird.f32 %v965_v15  ;;  %v1012_v14 = vld [vmem:[#allocation6 + $0x90] sm:$0xff] }
 0x2e1   :  { %vm486_vm15 = vmor %vm484_vm14, %vm485_vm13 }
 0x2e2   :  { %v481_v19 = vsub.f32 1.0, %v480_v18 }
 0x2e4   :  { %v482_v22 = vmul.f32 %v965_v15, %v481_v19 }
 0x2e6   :  { %v483_v39 = vadd.f32 %v965_v15, %v482_v22 }
 0x2e8   :  { %v487_v42 = vsel %vm486_vm15, %v965_v15, %v483_v39 }
 0x2e9   :  { %v492_v49 = vsel %vm489_vm1, %v491_v40, %v487_v42  ;;  %v1014_v40 = vld [vmem:[#allocation6 + $0x148] sm:$0xff]  ;;  %v1015_v42 = vld [vmem:[#allocation6 + $0x130] sm:$0xff] }
 0x2ea   :  { %v495_v54 = vmul.f32 %v494_v43, %v492_v49  ;;  %v503_v57 = vrot.slane %v492_v49, 1  ;;  %v1016_v43 = vld [vmem:[#allocation6 + $0x118] sm:$0xff]  ;;  %v1018_v49 = vld [vmem:[#allocation6 + $0xe8] sm:$0xff] }
 0x2ec   :  { %v499_v17 = vadd.f32 %v497_v44, %v495_v54  ;;  %v1017_v44 = vld [vmem:[#allocation6 + $0x100] sm:$0xff]  ;;  %v1019_v54 = vld [vmem:[#allocation6 + $0xd0] sm:$0xff] }
 0x2ee   :  { %966 = vtanh.f32 %v499_v17  ;;  %v1020_v17 = vld [vmem:[#allocation6 + $0xb8] sm:$0xff] }
 0x2f4   :  { %v967_v50 = vpop.eup %966 }
 0x2f5   :  { %v501_v56 = vsub.f32 %v1544_v48, %v967_v50  ;;  %v1610_v48 = vld [vmem:[#allocation6 + $0x160] sm:$0xff] }
 0x2f7   :  { %v505_v59 = vmul.f32 %v503_v57, %v501_v56  ;;  %v1022_v56 = vld [vmem:[#allocation6 + $0x88] sm:$0xff]  ;;  %v1023_v57 = vld [vmem:[#allocation6 + $0x70] sm:$0xff] }
 0x2f9   :  { %v1601_v55 = vadd.f32 %v967_v50, %v505_v59  ;;  %v1021_v50 = vld [vmem:[#allocation6 + $0xa0] sm:$0xff]  ;;  %v1024_v59 = vld [vmem:[#allocation6 + $0x58] sm:$0xff] }
 0x2fb   :  { %507 = vst [vmem:[#allocation8 + $0x3] sm:$0x1] %v1601_v55  ;;  %526 = vmatmul.f32.vlgmr.msrb.gmra.mxu0 %v1601_v55  ;;  %546 = vmatmul.f32.vlgmr.msrb.gmra.mxu1 %v1601_v55 }
 0x2fc   :  { %566 = vmatmul.f32.vlgmr.msrb.gmra.mxu2 %v1601_v55  ;;  %752 = vmatpush.msrb.mxu0 %v1607_v60 }
 0x2fd   :  { %813 = vmatpush.msrb.mxu1 %v993_v61  ;;  %833 = vmatpush.msrb.mxu2 %v994_v53  ;;  %v1027_v61 = vld [vmem:[#allocation6 + $0x10] sm:$0xff] }
 0x2fe   :  { %753 = vmatpush.msrb.mxu0 %v1610_v48 }
 0x2ff   :  { %814 = vmatpush.msrb.mxu1 %v996_v58  ;;  %834 = vmatpush.msrb.mxu2 %v997_v63  ;;  %v610_v58 = vld [vmem:[#allocation3 + $0x5] ss:$8 sm:$0x7] }
 0x300   :  { %754 = vmatpush.msrb.mxu0 %v1192_v16  ;;  %v1005_v16 = vld [vmem:[#allocation6 + $0xf8] sm:$0xff] }
 0x301   :  { %815 = vmatpush.msrb.mxu1 %v998_v51  ;;  %835 = vmatpush.msrb.mxu2 %v999_v52 }
 0x302   :  { %755 = vmatpush.msrb.mxu0 %v1205_v20  ;;  %v1007_v20 = vld [vmem:[#allocation6 + $0xe0] sm:$0xff] }
 0x303   :  { %816 = vmatpush.msrb.mxu1 %v1000_v6  ;;  %836 = vmatpush.msrb.mxu2 %v1001_v7 }
 0x304   :  { %756 = vmatpush.msrb.mxu0 %v1215_v23  ;;  %v1009_v23 = vld [vmem:[#allocation6 + $0xc8] sm:$0xff] }
 0x305   :  { %817 = vmatpush.msrb.mxu1 %v1002_v8  ;;  %837 = vmatpush.msrb.mxu2 %v1003_v9 }
 0x306   :  { %757 = vmatpush.msrb.mxu0 %v1225_v26  ;;  %v1011_v26 = vld [vmem:[#allocation6 + $0xb0] sm:$0xff] }
 0x307   :  { %818 = vmatpush.msrb.mxu1 %v1004_v10  ;;  %838 = vmatpush.msrb.mxu2 %v1005_v16 }
 0x308   :  { %758 = vmatpush.msrb.mxu0 %v1235_v29  ;;  %v1013_v29 = vld [vmem:[#allocation6 + $0x98] sm:$0xff] }
 0x309   :  { %819 = vmatpush.msrb.mxu1 %v1006_v11  ;;  %839 = vmatpush.msrb.mxu2 %v1007_v20 }
 0x30a   :  { %759 = vmatpush.msrb.mxu0 %v1245_v32 }
 0x30b   :  { %820 = vmatpush.msrb.mxu1 %v1008_v12  ;;  %840 = vmatpush.msrb.mxu2 %v1009_v23 }
 0x30c   :  { %760 = vmatpush.msrb.mxu0 %v1255_v35 }
 0x30d   :  { %821 = vmatpush.msrb.mxu1 %v1010_v13  ;;  %841 = vmatpush.msrb.mxu2 %v1011_v26 }
 0x30e   :  { %761 = vmatpush.msrb.mxu0 %v1265_v38 }
 0x30f   :  { %822 = vmatpush.msrb.mxu1 %v1012_v14  ;;  %842 = vmatpush.msrb.mxu2 %v1013_v29 }
 0x310   :  { %762 = vmatpush.msrb.mxu0 %v1275_v41 }
 0x311   :  { %823 = vmatpush.msrb.mxu1 %v1229_v28  ;;  %843 = vmatpush.msrb.mxu2 %v1227_v27  ;;  %v509_v28 = vld [vmem:[#allocation3 + $0x4] ss:$8 sm:$0x7] }
 0x312   :  { %763 = vmatpush.msrb.mxu0 %v1288_v45 }
 0x313   :  { %824 = vmatpush.msrb.mxu1 %v1239_v31  ;;  %844 = vmatpush.msrb.mxu2 %v1237_v30 }
 0x314   :  { %764 = vmatpush.msrb.mxu0 %v1295_v46 }
 0x315   :  { %825 = vmatpush.msrb.mxu1 %v1249_v34  ;;  %845 = vmatpush.msrb.mxu2 %v1247_v33 }
 0x316   :  { %765 = vmatpush.msrb.mxu0 %v1299_v47 }
 0x317   :  { %826 = vmatpush.msrb.mxu1 %v1259_v37  ;;  %846 = vmatpush.msrb.mxu2 %v1257_v36 }
 0x318   :  { %766 = vmatpush.msrb.mxu0 %v1695_v0 }
 0x319   :  { %827 = vmatpush.msrb.mxu1 %v1696_v1  ;;  %847 = vmatpush.msrb.mxu2 %v1697_v2 }
 0x31a   :  { %767 = vmatpush.msrb.mxu0 %v1698_v3 }
 0x31b   :  { %828 = vmatpush.msrb.mxu1 %v1699_v4  ;;  %848 = vmatpush.msrb.mxu2 %v1700_v5  ;;  %v598_v5 = vrot.slane %v509_v28, 2 }
 0x378   :  { %v547_v27 = vpop.f32.mrf.mxu1  ;;  %v527_v31 = vpop.f32.mrf.mxu0 }
 0x379   :  { %v572_v30 = vrot.slane %v547_v27, 7  ;;  %v699_v27 = vrot.slane %v610_v58, 2 }
 0x37b   :  { %v573_v32 = vsel %vm168_vm0, %v527_v31, %v572_v30 }
 0x37c   :  { %v575_v33 = vadd.f32 %v573_v32, %v509_v28 }
 0x37e   :  { %v935_v34 = vmul.f32 -1.442695, %v575_v33 }
 0x37f   :  { %v567_v0 = vpop.f32.mrf.mxu2 }
 0x380   :  { %968 = vpow2.f32 %v935_v34  ;;  %v595_v4 = vadd.f32 %v567_v0, %v1426_v62 }
 0x386   :  { %v969_v35 = vpop.eup %968 }
 0x387   :  { %v579_v36 = vadd.f32 1.0, %v969_v35 }
 0x389   :  { %970 = vrcp.f32 %v579_v36  ;;  %v591_v45 = vand.u32 2147483648, %v579_v36  ;;  %v589_v47 = vand.u32 2147483647, %v579_v36  ;;  %vm585_vm3 = vweird.f32 %v579_v36 }
 0x38b   :  { %v592_v2 = vor.u32 1.1754944e-38, %v591_v45  ;;  %vm590_vm5 = vcmp.eq.f32.partialorder %v589_v47, 8.507059e+37 }
 0x38f   :  { %v971_v37 = vpop.eup %970 }
 0x390   :  { %v581_v38 = vmul.f32 %v971_v37, %v579_v36  ;;  %vm586_vm2 = vweird.f32 %v971_v37 }
 0x391   :  { %vm587_vm4 = vmor %vm585_vm3, %vm586_vm2 }
 0x392   :  { %v582_v41 = vsub.f32 1.0, %v581_v38  ;;  %v711_v38 = vld [vmem:[#allocation3 + $0x6] ss:$8 sm:$0x7] }
 0x394   :  { %v583_v46 = vmul.f32 %v971_v37, %v582_v41 }
 0x396   :  { %v584_v1 = vadd.f32 %v971_v37, %v583_v46 }
 0x398   :  { %v588_v3 = vsel %vm587_vm4, %v971_v37, %v584_v1 }
 0x399   :  { %v593_v15 = vsel %vm590_vm5, %v592_v2, %v588_v3 }
 0x39a   :  { %v596_v18 = vmul.f32 %v595_v4, %v593_v15  ;;  %v604_v24 = vrot.slane %v593_v15, 1 }
 0x39c   :  { %v600_v19 = vadd.f32 %v598_v5, %v596_v18 }
 0x39e   :  { %972 = vtanh.f32 %v600_v19 }
 0x3a4   :  { %v973_v21 = vpop.eup %972 }
 0x3a5   :  { %v602_v22 = vsub.f32 %v1601_v55, %v973_v21  ;;  %v1025_v55 = vld [vmem:[#allocation6 + $0x40] sm:$0xff] }
 0x3a7   :  { %v606_v25 = vmul.f32 %v604_v24, %v602_v22 }
 0x3a9   :  { %v1642_v39 = vadd.f32 %v973_v21, %v606_v25 }
 0x3ab   :  { %608 = vst [vmem:[#allocation8 + $0x4] sm:$0x1] %v1642_v39  ;;  %627 = vmatmul.f32.vlgmr.msrb.gmra.mxu3 %v1642_v39  ;;  %647 = vmatmul.f32.vlgmr.msra.gmra.mxu0 %v1642_v39 }
 0x3ac   :  { %667 = vmatmul.f32.vlgmr.msra.gmra.mxu1 %v1642_v39  ;;  %853 = vmatpush.msrb.mxu3 %v1607_v60  ;;  %v1026_v60 = vld [vmem:[#allocation6 + $0x28] sm:$0xff] }
 0x3ae   :  { %854 = vmatpush.msrb.mxu3 %v1610_v48 }
 0x3b0   :  { %855 = vmatpush.msrb.mxu3 %v1014_v40  ;;  %v800_v40 = vrot.slane %v711_v38, 2 }
 0x3b2   :  { %856 = vmatpush.msrb.mxu3 %v1015_v42 }
 0x3b4   :  { %857 = vmatpush.msrb.mxu3 %v1016_v43 }
 0x3b6   :  { %858 = vmatpush.msrb.mxu3 %v1017_v44 }
 0x3b8   :  { %859 = vmatpush.msrb.mxu3 %v1018_v49 }
 0x3ba   :  { %860 = vmatpush.msrb.mxu3 %v1019_v54 }
 0x3bc   :  { %861 = vmatpush.msrb.mxu3 %v1020_v17 }
 0x3be   :  { %862 = vmatpush.msrb.mxu3 %v1021_v50 }
 0x3c0   :  { %863 = vmatpush.msrb.mxu3 %v1022_v56 }
 0x3c2   :  { %864 = vmatpush.msrb.mxu3 %v1023_v57 }
 0x3c4   :  { %865 = vmatpush.msrb.mxu3 %v1024_v59  ;;  %v812_v59 = vld [vmem:[#allocation3 + $0x7] ss:$8 sm:$0x7] }
 0x3c6   :  { %866 = vmatpush.msrb.mxu3 %v1025_v55 }
 0x3c8   :  { %867 = vmatpush.msrb.mxu3 %v1026_v60 }
 0x3ca   :  { %868 = vmatpush.msrb.mxu3 %v1027_v61 }
 0x428   :  { %v648_v53 = vpop.f32.mrf.mxu0 }
 0x429   :  { %v673_v48 = vrot.slane %v648_v53, 7  ;;  %v668_v23 = vpop.f32.mrf.mxu1 }
 0x42a   :  { %v696_v14 = vadd.f32 %v668_v23, %v1426_v62  ;;  %v901_v23 = vrot.slane %v812_v59, 2 }
 0x42e   :  { %v628_v63 = vpop.f32.mrf.mxu3 }
 0x42f   :  { %v674_v51 = vsel %vm168_vm0, %v628_v63, %v673_v48 }
 0x430   :  { %v676_v52 = vadd.f32 %v674_v51, %v610_v58 }
 0x432   :  { %v936_v6 = vmul.f32 -1.442695, %v676_v52 }
 0x434   :  { %974 = vpow2.f32 %v936_v6 }
 0x43a   :  { %v975_v7 = vpop.eup %974 }
 0x43b   :  { %v680_v8 = vadd.f32 1.0, %v975_v7 }
 0x43d   :  { %976 = vrcp.f32 %v680_v8  ;;  %v692_v11 = vand.u32 2147483648, %v680_v8  ;;  %v690_v12 = vand.u32 2147483647, %v680_v8  ;;  %vm686_vm7 = vweird.f32 %v680_v8 }
 0x43f   :  { %v693_v26 = vor.u32 1.1754944e-38, %v692_v11  ;;  %vm691_vm9 = vcmp.eq.f32.partialorder %v690_v12, 8.507059e+37 }
 0x443   :  { %v977_v9 = vpop.eup %976 }
 0x444   :  { %v682_v10 = vmul.f32 %v977_v9, %v680_v8  ;;  %vm687_vm6 = vweird.f32 %v977_v9 }
 0x445   :  { %vm688_vm8 = vmor %vm686_vm7, %vm687_vm6 }
 0x446   :  { %v683_v16 = vsub.f32 1.0, %v682_v10 }
 0x448   :  { %v684_v20 = vmul.f32 %v977_v9, %v683_v16 }
 0x44a   :  { %v685_v13 = vadd.f32 %v977_v9, %v684_v20 }
 0x44c   :  { %v689_v29 = vsel %vm688_vm8, %v977_v9, %v685_v13 }
 0x44d   :  { %v694_v28 = vsel %vm691_vm9, %v693_v26, %v689_v29 }
 0x44e   :  { %v697_v30 = vmul.f32 %v696_v14, %v694_v28  ;;  %v705_v34 = vrot.slane %v694_v28, 1 }
 0x450   :  { %v701_v31 = vadd.f32 %v699_v27, %v697_v30 }
 0x452   :  { %978 = vtanh.f32 %v701_v31 }
 0x458   :  { %v979_v32 = vpop.eup %978 }
 0x459   :  { %v703_v33 = vsub.f32 %v1642_v39, %v979_v32 }
 0x45b   :  { %v707_v35 = vmul.f32 %v705_v34, %v703_v33 }
 0x45d   :  { %v708_v36 = vadd.f32 %v979_v32, %v707_v35 }
 0x45f   :  { %709 = vst [vmem:[#allocation8 + $0x5] sm:$0x1] %v708_v36  ;;  %728 = vmatmul.f32.vlgmr.msra.gmra.mxu2 %v708_v36  ;;  %748 = vmatmul.f32.vlgmr.msra.gmra.mxu3 %v708_v36 }
 0x460   :  { %768 = vmatmul.f32.vlgmr.msrb.gmra.mxu0 %v708_v36 }
 0x4dd   :  { %v769_v21 = vpop.f32.mrf.mxu0 }
 0x4de   :  { %v797_v25 = vadd.f32 %v769_v21, %v1426_v62 }
 0x4e2   :  { %v749_v37 = vpop.f32.mrf.mxu3  ;;  %v729_v45 = vpop.f32.mrf.mxu2 }
 0x4e3   :  { %v774_v41 = vrot.slane %v749_v37, 7 }
 0x4e5   :  { %v775_v46 = vsel %vm168_vm0, %v729_v45, %v774_v41 }
 0x4e6   :  { %v777_v47 = vadd.f32 %v775_v46, %v711_v38 }
 0x4e8   :  { %v937_v0 = vmul.f32 -1.442695, %v777_v47 }
 0x4ea   :  { %980 = vpow2.f32 %v937_v0 }
 0x4f0   :  { %v981_v1 = vpop.eup %980 }
 0x4f1   :  { %v781_v2 = vadd.f32 1.0, %v981_v1 }
 0x4f3   :  { %982 = vrcp.f32 %v781_v2  ;;  %v793_v15 = vand.u32 2147483648, %v781_v2  ;;  %v791_v19 = vand.u32 2147483647, %v781_v2  ;;  %vm787_vm11 = vweird.f32 %v781_v2 }
 0x4f5   :  { %v794_v24 = vor.u32 1.1754944e-38, %v793_v15  ;;  %vm792_vm13 = vcmp.eq.f32.partialorder %v791_v19, 8.507059e+37 }
 0x4f9   :  { %v983_v3 = vpop.eup %982 }
 0x4fa   :  { %v783_v4 = vmul.f32 %v983_v3, %v781_v2  ;;  %vm788_vm10 = vweird.f32 %v983_v3 }
 0x4fb   :  { %vm789_vm12 = vmor %vm787_vm11, %vm788_vm10 }
 0x4fc   :  { %v784_v5 = vsub.f32 1.0, %v783_v4 }
 0x4fe   :  { %v785_v18 = vmul.f32 %v983_v3, %v784_v5 }
 0x500   :  { %v786_v22 = vadd.f32 %v983_v3, %v785_v18 }
 0x502   :  { %v790_v39 = vsel %vm789_vm12, %v983_v3, %v786_v22 }
 0x503   :  { %v795_v42 = vsel %vm792_vm13, %v794_v24, %v790_v39 }
 0x504   :  { %v798_v43 = vmul.f32 %v797_v25, %v795_v42  ;;  %v806_v54 = vrot.slane %v795_v42, 1 }
 0x506   :  { %v802_v44 = vadd.f32 %v800_v40, %v798_v43 }
 0x508   :  { %984 = vtanh.f32 %v802_v44 }
 0x50e   :  { %v985_v49 = vpop.eup %984 }
 0x50f   :  { %v804_v17 = vsub.f32 %v708_v36, %v985_v49 }
 0x511   :  { %v808_v50 = vmul.f32 %v806_v54, %v804_v17 }
 0x513   :  { %v809_v56 = vadd.f32 %v985_v49, %v808_v50 }
 0x515   :  { %810 = vst [vmem:[#allocation8 + $0x6] sm:$0x1] %v809_v56  ;;  %829 = vmatmul.f32.vlgmr.msrb.gmra.mxu1 %v809_v56  ;;  %849 = vmatmul.f32.vlgmr.msrb.gmra.mxu2 %v809_v56 }
 0x516   :  { %869 = vmatmul.f32.vlgmr.msrb.gmra.mxu3 %v809_v56 }
 0x592   :  { %v830_v60 = vpop.f32.mrf.mxu1 }
 0x598   :  { %v850_v57 = vpop.f32.mrf.mxu2 }
 0x599   :  { %v875_v55 = vrot.slane %v850_v57, 7  ;;  %v870_v10 = vpop.f32.mrf.mxu3 }
 0x59a   :  { %v898_v12 = vadd.f32 %v870_v10, %v1426_v62 }
 0x59b   :  { %v876_v61 = vsel %vm168_vm0, %v830_v60, %v875_v55 }
 0x59c   :  { %v878_v53 = vadd.f32 %v876_v61, %v812_v59 }
 0x59e   :  { %v938_v48 = vmul.f32 -1.442695, %v878_v53 }
 0x5a0   :  { %986 = vpow2.f32 %v938_v48 }
 0x5a6   :  { %v987_v58 = vpop.eup %986 }
 0x5a7   :  { %v882_v63 = vadd.f32 1.0, %v987_v58 }
 0x5a9   :  { %988 = vrcp.f32 %v882_v63  ;;  %v894_v7 = vand.u32 2147483648, %v882_v63  ;;  %v892_v9 = vand.u32 2147483647, %v882_v63  ;;  %vm888_vm15 = vweird.f32 %v882_v63 }
 0x5ab   :  { %v895_v11 = vor.u32 1.1754944e-38, %v894_v7  ;;  %vm893_vm0 = vcmp.eq.f32.partialorder %v892_v9, 8.507059e+37 }
 0x5af   :  { %v989_v51 = vpop.eup %988 }
 0x5b0   :  { %v884_v52 = vmul.f32 %v989_v51, %v882_v63  ;;  %vm889_vm14 = vweird.f32 %v989_v51 }
 0x5b1   :  { %vm890_vm1 = vmor %vm888_vm15, %vm889_vm14 }
 0x5b2   :  { %v885_v6 = vsub.f32 1.0, %v884_v52 }
 0x5b4   :  { %v886_v8 = vmul.f32 %v989_v51, %v885_v6 }
 0x5b6   :  { %v887_v16 = vadd.f32 %v989_v51, %v886_v8 }
 0x5b8   :  { %v891_v20 = vsel %vm890_vm1, %v989_v51, %v887_v16 }
 0x5b9   :  { %v896_v13 = vsel %vm893_vm0, %v895_v11, %v891_v20 }
 0x5ba   :  { %v899_v26 = vmul.f32 %v898_v12, %v896_v13  ;;  %v907_v28 = vrot.slane %v896_v13, 1 }
 0x5bc   :  { %v903_v14 = vadd.f32 %v901_v23, %v899_v26 }
 0x5be   :  { %990 = vtanh.f32 %v903_v14 }
 0x5c4   :  { %v991_v29 = vpop.eup %990 }
 0x5c5   :  { %v905_v27 = vsub.f32 %v809_v56, %v991_v29 }
 0x5c7   :  { %v909_v30 = vmul.f32 %v907_v28, %v905_v27 }
 0x5c9   :  { %v910_v31 = vadd.f32 %v991_v29, %v909_v30 }
 0x5cb   :  { %911 = vst [vmem:[#allocation8 + $0x7] sm:$0x1] %v910_v31 }
 0x5cc   :  { %912 = vst [vmem:[#allocation2] sm:$0x1] %v910_v31  ;;  %923 = dma.vmem_to_hbm [thread:$0]  %s919_s28, 128, %s921_s5, [#allocation5]  }
 0x5cd   :  { %1104 = dma.done.wait [#allocation5], 128  }
 0x5ce   :  { %1105 = vsyncadd [#allocation5], 4294967168 }
 0x5cf   :  { %928 = vsyncpa [#allocation4], 1 }
 0x5d0   :  { %929 = vsyncpa [#allocation7], 1 }
 0x5d1   :  { %930 = vsyncpa [#allocation5], 1 }

</bundles_post_ra>
